<compile_context>
chip_gen: v5e
topology: v5e:2x2
jax: 0.10.0
libtpu: 0.0.40
codegen_flags: <defaults>
</compile_context>

<pallas_src>
import random
from functools import partial

import jax
import jax.numpy as jnp
from jax.experimental import pallas as pl
from jax.experimental.pallas import tpu as pltpu

INPUT_SIZE = 22      # hard-coded by the decoder's x_input.view([-1, 1, 22])
I_PAD = 32           # input feature dim zero-padded to a lane-aligned width
HIDDEN_SIZE = 32


# ------------------------------------------------------------------ kernel

def seq2seq_kernel(x_ref, tgt_ref, w_ref, b_ref, lin_ref, out_ref,
                   *, enc_len, target_len, teacher_mask):
    """Encoder LSTM (enc_len steps) -> decoder LSTM + Linear (target_len steps),
    fully unrolled; h/c stay in vregs for the whole forward pass.

    x_ref   : (enc_len, B, I_PAD)     time-major, zero-padded inputs
    tgt_ref : (target_len, B, I_PAD)  time-major, zero-padded targets
    w_ref   : (2, I_PAD + H, 4H)      fused [Wih_pad ; Whh] (0=encoder, 1=decoder)
    b_ref   : (2, 4H)                 combined b_ih + b_hh (0=encoder, 1=decoder)
    lin_ref : (H + 1, I_PAD)          [lin_W^T ; lin_b], output lanes 22..31 zero
    out_ref : (target_len * B, I_PAD)
    """
    B = x_ref.shape[1]
    H = HIDDEN_SIZE

    # --- load weights once, hoist bias broadcasts out of the unrolled loops ---
    ew = w_ref[0]
    dw = w_ref[1]
    eb = jnp.broadcast_to(b_ref[0:1, :], (B, 4 * H))
    db = jnp.broadcast_to(b_ref[1:2, :], (B, 4 * H))
    lw = lin_ref[:H, :]
    lb = jnp.broadcast_to(lin_ref[H:H + 1, :], (B, I_PAD))

    def cell(x_pad, h, c, w, b):
        # single fused MXU push per step: (B, I_PAD+H) @ (I_PAD+H, 4H)
        xh = jnp.concatenate([x_pad, h], axis=-1)
        gates = jnp.dot(xh, w, preferred_element_type=jnp.float32) + b
        # two full-vreg EUP passes instead of four 32-lane ones
        sg = jax.nn.sigmoid(gates)
        th = jnp.tanh(gates)
        i = sg[:, 0 * H:1 * H]
        f = sg[:, 1 * H:2 * H]
        g = th[:, 2 * H:3 * H]
        o = sg[:, 3 * H:4 * H]
        c_new = f * c + i * g
        h_new = o * jnp.tanh(c_new)
        return h_new, c_new

    h = jnp.zeros((B, H), jnp.float32)
    c = jnp.zeros((B, H), jnp.float32)

    # --- encoder: leading-axis time reads are pure address offsets ---
    for t in range(enc_len):
        h, c = cell(x_ref[t], h, c, ew, eb)

    # --- decoder; Linear head deferred off the serial recurrence chain ---
    dec_in = x_ref[enc_len - 1]                 # inputs[:, -1, :] (already padded)
    hs = []
    for t in range(target_len):
        h, c = cell(dec_in, h, c, dw, db)
        hs.append(h)
        if teacher_mask[t]:                     # static trace-time decision
            dec_in = tgt_ref[t]
        else:
            # linear output feeds the next step; padded lanes stay zero because
            # lw/lb columns 22..31 are zero, so it is directly a padded input.
            dec_in = jnp.dot(h, lw, preferred_element_type=jnp.float32) + lb

    # one stacked matmul + a single store for all target_len outputs
    h_all = jnp.concatenate(hs, axis=0)                          # (target_len*B, H)
    out_all = (jnp.dot(h_all, lw, preferred_element_type=jnp.float32)
               + jnp.broadcast_to(lin_ref[H:H + 1, :], (target_len * B, I_PAD)))
    out_ref[...] = out_all


# ------------------------------------------------------------------ wrapper

def _fuse_params(params):
    """Pack the 10 PyTorch-style tensors into 3 contiguous kernel slabs."""
    I, H = INPUT_SIZE, HIDDEN_SIZE

    def fuse_lstm(wih_t, whh_t):
        wih_pad = jnp.zeros((I_PAD, 4 * H), jnp.float32).at[:I, :].set(wih_t)
        return jnp.concatenate([wih_pad, whh_t], axis=0)         # (I_PAD+H, 4H)

    w_fused = jnp.stack([fuse_lstm(params["enc_wih_t"], params["enc_whh_t"]),
                         fuse_lstm(params["dec_wih_t"], params["dec_whh_t"])])
    b_fused = jnp.concatenate([params["enc_b"], params["dec_b"]], axis=0)   # (2, 4H)
    lw_pad = jnp.zeros((H, I_PAD), jnp.float32).at[:, :I].set(params["lin_w_t"])
    lb_pad = jnp.zeros((1, I_PAD), jnp.float32).at[:, :I].set(params["lin_b"])
    lin_fused = jnp.concatenate([lw_pad, lb_pad], axis=0)                   # (H+1, I_PAD)
    return w_fused, b_fused, lin_fused


@partial(jax.jit, static_argnums=(3, 4, 5))
def forward(inputs, targets, params, target_len, teacher_forcing_ratio, seed=0):
    """Mirrors lstm_encoder_decoder.forward.  Teacher-forcing coin flips come
    from a seeded Python RNG, drawn one per decoder step in order (trace-time,
    static; jit cache key includes seed/ratio/target_len so masks never go
    stale)."""
    rng = random.Random(seed)
    teacher_mask = tuple(rng.random() < teacher_forcing_ratio
                         for _ in range(target_len))

    B, T, I = inputs.shape
    pad = ((0, 0), (0, 0), (0, I_PAD - I))
    x_pad = jnp.pad(jnp.transpose(inputs, (1, 0, 2)), pad)        # (T, B, I_PAD)
    tgt_pad = jnp.pad(jnp.transpose(targets, (1, 0, 2)), pad)     # (target_len, B, I_PAD)
    w_fused, b_fused, lin_fused = _fuse_params(params)

    vmem = pl.BlockSpec(memory_space=pltpu.MemorySpace.VMEM)
    out_flat = pl.pallas_call(
        partial(seq2seq_kernel, enc_len=T, target_len=target_len,
                teacher_mask=teacher_mask),
        out_shape=jax.ShapeDtypeStruct((target_len * B, I_PAD), jnp.float32),
        in_specs=[vmem] * 5,
        out_specs=vmem,
    )(x_pad, tgt_pad, w_fused, b_fused, lin_fused)

    out = out_flat.reshape(target_len, B, I_PAD)
    return jnp.transpose(out, (1, 0, 2))[:, :, :I]                # (B, target_len, I)


# ------------------------------------------------------------------ reference

def _ref_cell(x, h, c, wih_t, whh_t, b):
    gates = x @ wih_t + h @ whh_t + b
    H = h.shape[-1]
    i = jax.nn.sigmoid(gates[:, 0 * H:1 * H])
    f = jax.nn.sigmoid(gates[:, 1 * H:2 * H])
    g = jnp.tanh(gates[:, 2 * H:3 * H])
    o = jax.nn.sigmoid(gates[:, 3 * H:4 * H])
    c_new = f * c + i * g
    h_new = o * jnp.tanh(c_new)
    return h_new, c_new


def forward_ref(inputs, targets, target_len, teacher_forcing_ratio, params, seed=0):
    rng = random.Random(seed)
    B = inputs.shape[0]
    H = HIDDEN_SIZE
    h = jnp.zeros((B, H), jnp.float32)
    c = jnp.zeros((B, H), jnp.float32)
    for t in range(inputs.shape[1]):
        h, c = _ref_cell(inputs[:, t, :], h, c,
                         params["enc_wih_t"], params["enc_whh_t"], params["enc_b"])
    decoder_input = inputs[:, -1, :]
    outs = []
    for t in range(target_len):
        h, c = _ref_cell(decoder_input, h, c,
                         params["dec_wih_t"], params["dec_whh_t"], params["dec_b"])
        out = h @ params["lin_w_t"] + params["lin_b"]
        if rng.random() < teacher_forcing_ratio:
            decoder_input = targets[:, t, :]
        else:
            decoder_input = out
        outs.append(out)
    return jnp.stack(outs, axis=1)


# ------------------------------------------------------------------ params

def init_params(key, input_size=INPUT_SIZE, hidden_size=HIDDEN_SIZE):
    """PyTorch-style uniform(-1/sqrt(H), 1/sqrt(H)) init, deterministic."""
    H, I = hidden_size, input_size
    k_lstm = 1.0 / jnp.sqrt(jnp.float32(H))
    k_lin = 1.0 / jnp.sqrt(jnp.float32(H))
    keys = jax.random.split(key, 12)

    def u(k, shape, bound):
        return jax.random.uniform(k, shape, jnp.float32, -bound, bound)

    params = {
        # encoder LSTM (weights pre-transposed; biases combined b_ih + b_hh)
        "enc_wih_t": u(keys[0], (I, 4 * H), k_lstm),
        "enc_whh_t": u(keys[1], (H, 4 * H), k_lstm),
        "enc_b": u(keys[2], (1, 4 * H), k_lstm) + u(keys[3], (1, 4 * H), k_lstm),
        # decoder LSTM
        "dec_wih_t": u(keys[4], (I, 4 * H), k_lstm),
        "dec_whh_t": u(keys[5], (H, 4 * H), k_lstm),
        "dec_b": u(keys[6], (1, 4 * H), k_lstm) + u(keys[7], (1, 4 * H), k_lstm),
        # decoder output Linear(hidden -> input)
        "lin_w_t": u(keys[8], (H, I), k_lin),
        "lin_b": u(keys[9], (1, I), k_lin),
    }
    return params


# ------------------------------------------------------------------ main

if __name__ == "__main__":
    key = jax.random.PRNGKey(0)
    k_in, k_tgt, k_param = jax.random.split(key, 3)

    B, T_IN, TARGET_LEN = 2, 8, 4
    inputs = jax.random.normal(k_in, (B, T_IN, INPUT_SIZE), jnp.float32)
    targets = jax.random.normal(k_tgt, (B, TARGET_LEN, INPUT_SIZE), jnp.float32)
    params = init_params(k_param)

    teacher_forcing_ratio = 0.5

    out = forward(inputs, targets, params, TARGET_LEN, teacher_forcing_ratio, 0)
    out = jax.block_until_ready(out)

    ref = forward_ref(inputs, targets, TARGET_LEN, teacher_forcing_ratio, params, seed=0)
    ref = jax.block_until_ready(ref)

    assert out.shape == (B, TARGET_LEN, INPUT_SIZE), out.shape
    assert jnp.allclose(out, ref, atol=1e-4, rtol=1e-4), \
        f"max abs err {jnp.max(jnp.abs(out - ref))}"

    print("KERNEL_OK")
</pallas_src>

<mosaic_0001>
module attributes {stable_mosaic.version = 11 : i64} {
  func.func @seq2seq_kernel(%arg0: memref<8x2x32xf32, #tpu.memory_space<vmem>>, %arg1: memref<4x2x32xf32, #tpu.memory_space<vmem>>, %arg2: memref<2x64x128xf32, #tpu.memory_space<vmem>>, %arg3: memref<2x128xf32, #tpu.memory_space<vmem>>, %arg4: memref<33x32xf32, #tpu.memory_space<vmem>>, %arg5: memref<8x32xf32, #tpu.memory_space<vmem>>) attributes {dimension_semantics = [], scalar_prefetch = 0 : i64, scratch_operands = 0 : i64, tpu.core_type = #tpu.core_type<tc>} {
    %c0 = arith.constant 0 : index
    %c0_0 = arith.constant 0 : index
    %c0_1 = arith.constant 0 : index
    %0 = vector.load %arg2[%c0, %c0_0, %c0_1] : memref<2x64x128xf32, #tpu.memory_space<vmem>>, vector<1x64x128xf32>
    %1 = vector.shape_cast %0 : vector<1x64x128xf32> to vector<64x128xf32>
    %c1 = arith.constant 1 : index
    %c0_2 = arith.constant 0 : index
    %c0_3 = arith.constant 0 : index
    %2 = vector.load %arg2[%c1, %c0_2, %c0_3] : memref<2x64x128xf32, #tpu.memory_space<vmem>>, vector<1x64x128xf32>
    %3 = vector.shape_cast %2 : vector<1x64x128xf32> to vector<64x128xf32>
    %c0_4 = arith.constant 0 : index
    %c0_5 = arith.constant 0 : index
    %4 = vector.load %arg3[%c0_4, %c0_5] : memref<2x128xf32, #tpu.memory_space<vmem>>, vector<1x128xf32>
    %5 = vector.shape_cast %4 : vector<1x128xf32> to vector<1x128xf32>
    %6 = vector.broadcast %5 : vector<1x128xf32> to vector<2x128xf32>
    %c1_6 = arith.constant 1 : index
    %c0_7 = arith.constant 0 : index
    %7 = vector.load %arg3[%c1_6, %c0_7] : memref<2x128xf32, #tpu.memory_space<vmem>>, vector<1x128xf32>
    %8 = vector.shape_cast %7 : vector<1x128xf32> to vector<1x128xf32>
    %9 = vector.broadcast %8 : vector<1x128xf32> to vector<2x128xf32>
    %c0_8 = arith.constant 0 : index
    %c0_9 = arith.constant 0 : index
    %10 = vector.load %arg4[%c0_8, %c0_9] : memref<33x32xf32, #tpu.memory_space<vmem>>, vector<32x32xf32>
    %c32 = arith.constant 32 : index
    %c0_10 = arith.constant 0 : index
    %11 = vector.load %arg4[%c32, %c0_10] : memref<33x32xf32, #tpu.memory_space<vmem>>, vector<1x32xf32>
    %12 = vector.shape_cast %11 : vector<1x32xf32> to vector<1x32xf32>
    %13 = vector.broadcast %12 : vector<1x32xf32> to vector<2x32xf32>
    %cst = arith.constant 0.000000e+00 : f32
    %14 = vector.broadcast %cst : f32 to vector<2x32xf32>
    %cst_11 = arith.constant 0.000000e+00 : f32
    %15 = vector.broadcast %cst_11 : f32 to vector<2x32xf32>
    %c0_12 = arith.constant 0 : index
    %c0_13 = arith.constant 0 : index
    %c0_14 = arith.constant 0 : index
    %16 = vector.load %arg0[%c0_12, %c0_13, %c0_14] : memref<8x2x32xf32, #tpu.memory_space<vmem>>, vector<1x2x32xf32>
    %17 = vector.shape_cast %16 : vector<1x2x32xf32> to vector<2x32xf32>
    %18 = tpu.concatenate %17, %14 in 1 : vector<2x32xf32>, vector<2x32xf32> -> vector<2x64xf32>
    %cst_15 = arith.constant dense<0.000000e+00> : vector<2x128xf32>
    %19 = tpu.matmul %18, %1, %cst_15 {dimension_numbers = #tpu.dot_dimension_numbers<[1], [0], [0], [1], [0, 0, 1, 1], [], []>} : vector<2x64xf32>, vector<64x128xf32>, vector<2x128xf32> -> vector<2x128xf32>
    %20 = arith.addf %19, %6 : vector<2x128xf32>
    %21 = arith.negf %20 : vector<2x128xf32>
    %22 = math.exp %21 : vector<2x128xf32>
    %cst_16 = arith.constant 1.000000e+00 : f32
    %23 = vector.broadcast %cst_16 : f32 to vector<2x128xf32>
    %24 = arith.addf %23, %22 : vector<2x128xf32>
    %25 = arith.divf %23, %24 : vector<2x128xf32>
    %26 = math.tanh %20 : vector<2x128xf32>
    %27 = vector.extract_strided_slice %25 {offsets = [0, 0], sizes = [2, 32], strides = [1, 1]} : vector<2x128xf32> to vector<2x32xf32>
    %28 = vector.extract_strided_slice %25 {offsets = [0, 32], sizes = [2, 32], strides = [1, 1]} : vector<2x128xf32> to vector<2x32xf32>
    %29 = vector.extract_strided_slice %26 {offsets = [0, 64], sizes = [2, 32], strides = [1, 1]} : vector<2x128xf32> to vector<2x32xf32>
    %30 = vector.extract_strided_slice %25 {offsets = [0, 96], sizes = [2, 32], strides = [1, 1]} : vector<2x128xf32> to vector<2x32xf32>
    %31 = arith.mulf %28, %15 : vector<2x32xf32>
    %32 = arith.mulf %27, %29 : vector<2x32xf32>
    %33 = arith.addf %31, %32 : vector<2x32xf32>
    %34 = math.tanh %33 : vector<2x32xf32>
    %35 = arith.mulf %30, %34 : vector<2x32xf32>
    %c1_17 = arith.constant 1 : index
    %c0_18 = arith.constant 0 : index
    %c0_19 = arith.constant 0 : index
    %36 = vector.load %arg0[%c1_17, %c0_18, %c0_19] : memref<8x2x32xf32, #tpu.memory_space<vmem>>, vector<1x2x32xf32>
    %37 = vector.shape_cast %36 : vector<1x2x32xf32> to vector<2x32xf32>
    %38 = tpu.concatenate %37, %35 in 1 : vector<2x32xf32>, vector<2x32xf32> -> vector<2x64xf32>
    %cst_20 = arith.constant dense<0.000000e+00> : vector<2x128xf32>
    %39 = tpu.matmul %38, %1, %cst_20 {dimension_numbers = #tpu.dot_dimension_numbers<[1], [0], [0], [1], [0, 0, 1, 1], [], []>} : vector<2x64xf32>, vector<64x128xf32>, vector<2x128xf32> -> vector<2x128xf32>
    %40 = arith.addf %39, %6 : vector<2x128xf32>
    %41 = arith.negf %40 : vector<2x128xf32>
    %42 = math.exp %41 : vector<2x128xf32>
    %cst_21 = arith.constant 1.000000e+00 : f32
    %43 = vector.broadcast %cst_21 : f32 to vector<2x128xf32>
    %44 = arith.addf %43, %42 : vector<2x128xf32>
    %45 = arith.divf %43, %44 : vector<2x128xf32>
    %46 = math.tanh %40 : vector<2x128xf32>
    %47 = vector.extract_strided_slice %45 {offsets = [0, 0], sizes = [2, 32], strides = [1, 1]} : vector<2x128xf32> to vector<2x32xf32>
    %48 = vector.extract_strided_slice %45 {offsets = [0, 32], sizes = [2, 32], strides = [1, 1]} : vector<2x128xf32> to vector<2x32xf32>
    %49 = vector.extract_strided_slice %46 {offsets = [0, 64], sizes = [2, 32], strides = [1, 1]} : vector<2x128xf32> to vector<2x32xf32>
    %50 = vector.extract_strided_slice %45 {offsets = [0, 96], sizes = [2, 32], strides = [1, 1]} : vector<2x128xf32> to vector<2x32xf32>
    %51 = arith.mulf %48, %33 : vector<2x32xf32>
    %52 = arith.mulf %47, %49 : vector<2x32xf32>
    %53 = arith.addf %51, %52 : vector<2x32xf32>
    %54 = math.tanh %53 : vector<2x32xf32>
    %55 = arith.mulf %50, %54 : vector<2x32xf32>
    %c2 = arith.constant 2 : index
    %c0_22 = arith.constant 0 : index
    %c0_23 = arith.constant 0 : index
    %56 = vector.load %arg0[%c2, %c0_22, %c0_23] : memref<8x2x32xf32, #tpu.memory_space<vmem>>, vector<1x2x32xf32>
    %57 = vector.shape_cast %56 : vector<1x2x32xf32> to vector<2x32xf32>
    %58 = tpu.concatenate %57, %55 in 1 : vector<2x32xf32>, vector<2x32xf32> -> vector<2x64xf32>
    %cst_24 = arith.constant dense<0.000000e+00> : vector<2x128xf32>
    %59 = tpu.matmul %58, %1, %cst_24 {dimension_numbers = #tpu.dot_dimension_numbers<[1], [0], [0], [1], [0, 0, 1, 1], [], []>} : vector<2x64xf32>, vector<64x128xf32>, vector<2x128xf32> -> vector<2x128xf32>
    %60 = arith.addf %59, %6 : vector<2x128xf32>
    %61 = arith.negf %60 : vector<2x128xf32>
    %62 = math.exp %61 : vector<2x128xf32>
    %cst_25 = arith.constant 1.000000e+00 : f32
    %63 = vector.broadcast %cst_25 : f32 to vector<2x128xf32>
    %64 = arith.addf %63, %62 : vector<2x128xf32>
    %65 = arith.divf %63, %64 : vector<2x128xf32>
    %66 = math.tanh %60 : vector<2x128xf32>
    %67 = vector.extract_strided_slice %65 {offsets = [0, 0], sizes = [2, 32], strides = [1, 1]} : vector<2x128xf32> to vector<2x32xf32>
    %68 = vector.extract_strided_slice %65 {offsets = [0, 32], sizes = [2, 32], strides = [1, 1]} : vector<2x128xf32> to vector<2x32xf32>
    %69 = vector.extract_strided_slice %66 {offsets = [0, 64], sizes = [2, 32], strides = [1, 1]} : vector<2x128xf32> to vector<2x32xf32>
    %70 = vector.extract_strided_slice %65 {offsets = [0, 96], sizes = [2, 32], strides = [1, 1]} : vector<2x128xf32> to vector<2x32xf32>
    %71 = arith.mulf %68, %53 : vector<2x32xf32>
    %72 = arith.mulf %67, %69 : vector<2x32xf32>
    %73 = arith.addf %71, %72 : vector<2x32xf32>
    %74 = math.tanh %73 : vector<2x32xf32>
    %75 = arith.mulf %70, %74 : vector<2x32xf32>
    %c3 = arith.constant 3 : index
    %c0_26 = arith.constant 0 : index
    %c0_27 = arith.constant 0 : index
    %76 = vector.load %arg0[%c3, %c0_26, %c0_27] : memref<8x2x32xf32, #tpu.memory_space<vmem>>, vector<1x2x32xf32>
    %77 = vector.shape_cast %76 : vector<1x2x32xf32> to vector<2x32xf32>
    %78 = tpu.concatenate %77, %75 in 1 : vector<2x32xf32>, vector<2x32xf32> -> vector<2x64xf32>
    %cst_28 = arith.constant dense<0.000000e+00> : vector<2x128xf32>
    %79 = tpu.matmul %78, %1, %cst_28 {dimension_numbers = #tpu.dot_dimension_numbers<[1], [0], [0], [1], [0, 0, 1, 1], [], []>} : vector<2x64xf32>, vector<64x128xf32>, vector<2x128xf32> -> vector<2x128xf32>
    %80 = arith.addf %79, %6 : vector<2x128xf32>
    %81 = arith.negf %80 : vector<2x128xf32>
    %82 = math.exp %81 : vector<2x128xf32>
    %cst_29 = arith.constant 1.000000e+00 : f32
    %83 = vector.broadcast %cst_29 : f32 to vector<2x128xf32>
    %84 = arith.addf %83, %82 : vector<2x128xf32>
    %85 = arith.divf %83, %84 : vector<2x128xf32>
    %86 = math.tanh %80 : vector<2x128xf32>
    %87 = vector.extract_strided_slice %85 {offsets = [0, 0], sizes = [2, 32], strides = [1, 1]} : vector<2x128xf32> to vector<2x32xf32>
    %88 = vector.extract_strided_slice %85 {offsets = [0, 32], sizes = [2, 32], strides = [1, 1]} : vector<2x128xf32> to vector<2x32xf32>
    %89 = vector.extract_strided_slice %86 {offsets = [0, 64], sizes = [2, 32], strides = [1, 1]} : vector<2x128xf32> to vector<2x32xf32>
    %90 = vector.extract_strided_slice %85 {offsets = [0, 96], sizes = [2, 32], strides = [1, 1]} : vector<2x128xf32> to vector<2x32xf32>
    %91 = arith.mulf %88, %73 : vector<2x32xf32>
    %92 = arith.mulf %87, %89 : vector<2x32xf32>
    %93 = arith.addf %91, %92 : vector<2x32xf32>
    %94 = math.tanh %93 : vector<2x32xf32>
    %95 = arith.mulf %90, %94 : vector<2x32xf32>
    %c4 = arith.constant 4 : index
    %c0_30 = arith.constant 0 : index
    %c0_31 = arith.constant 0 : index
    %96 = vector.load %arg0[%c4, %c0_30, %c0_31] : memref<8x2x32xf32, #tpu.memory_space<vmem>>, vector<1x2x32xf32>
    %97 = vector.shape_cast %96 : vector<1x2x32xf32> to vector<2x32xf32>
    %98 = tpu.concatenate %97, %95 in 1 : vector<2x32xf32>, vector<2x32xf32> -> vector<2x64xf32>
    %cst_32 = arith.constant dense<0.000000e+00> : vector<2x128xf32>
    %99 = tpu.matmul %98, %1, %cst_32 {dimension_numbers = #tpu.dot_dimension_numbers<[1], [0], [0], [1], [0, 0, 1, 1], [], []>} : vector<2x64xf32>, vector<64x128xf32>, vector<2x128xf32> -> vector<2x128xf32>
    %100 = arith.addf %99, %6 : vector<2x128xf32>
    %101 = arith.negf %100 : vector<2x128xf32>
    %102 = math.exp %101 : vector<2x128xf32>
    %cst_33 = arith.constant 1.000000e+00 : f32
    %103 = vector.broadcast %cst_33 : f32 to vector<2x128xf32>
    %104 = arith.addf %103, %102 : vector<2x128xf32>
    %105 = arith.divf %103, %104 : vector<2x128xf32>
    %106 = math.tanh %100 : vector<2x128xf32>
    %107 = vector.extract_strided_slice %105 {offsets = [0, 0], sizes = [2, 32], strides = [1, 1]} : vector<2x128xf32> to vector<2x32xf32>
    %108 = vector.extract_strided_slice %105 {offsets = [0, 32], sizes = [2, 32], strides = [1, 1]} : vector<2x128xf32> to vector<2x32xf32>
    %109 = vector.extract_strided_slice %106 {offsets = [0, 64], sizes = [2, 32], strides = [1, 1]} : vector<2x128xf32> to vector<2x32xf32>
    %110 = vector.extract_strided_slice %105 {offsets = [0, 96], sizes = [2, 32], strides = [1, 1]} : vector<2x128xf32> to vector<2x32xf32>
    %111 = arith.mulf %108, %93 : vector<2x32xf32>
    %112 = arith.mulf %107, %109 : vector<2x32xf32>
    %113 = arith.addf %111, %112 : vector<2x32xf32>
    %114 = math.tanh %113 : vector<2x32xf32>
    %115 = arith.mulf %110, %114 : vector<2x32xf32>
    %c5 = arith.constant 5 : index
    %c0_34 = arith.constant 0 : index
    %c0_35 = arith.constant 0 : index
    %116 = vector.load %arg0[%c5, %c0_34, %c0_35] : memref<8x2x32xf32, #tpu.memory_space<vmem>>, vector<1x2x32xf32>
    %117 = vector.shape_cast %116 : vector<1x2x32xf32> to vector<2x32xf32>
    %118 = tpu.concatenate %117, %115 in 1 : vector<2x32xf32>, vector<2x32xf32> -> vector<2x64xf32>
    %cst_36 = arith.constant dense<0.000000e+00> : vector<2x128xf32>
    %119 = tpu.matmul %118, %1, %cst_36 {dimension_numbers = #tpu.dot_dimension_numbers<[1], [0], [0], [1], [0, 0, 1, 1], [], []>} : vector<2x64xf32>, vector<64x128xf32>, vector<2x128xf32> -> vector<2x128xf32>
    %120 = arith.addf %119, %6 : vector<2x128xf32>
    %121 = arith.negf %120 : vector<2x128xf32>
    %122 = math.exp %121 : vector<2x128xf32>
    %cst_37 = arith.constant 1.000000e+00 : f32
    %123 = vector.broadcast %cst_37 : f32 to vector<2x128xf32>
    %124 = arith.addf %123, %122 : vector<2x128xf32>
    %125 = arith.divf %123, %124 : vector<2x128xf32>
    %126 = math.tanh %120 : vector<2x128xf32>
    %127 = vector.extract_strided_slice %125 {offsets = [0, 0], sizes = [2, 32], strides = [1, 1]} : vector<2x128xf32> to vector<2x32xf32>
    %128 = vector.extract_strided_slice %125 {offsets = [0, 32], sizes = [2, 32], strides = [1, 1]} : vector<2x128xf32> to vector<2x32xf32>
    %129 = vector.extract_strided_slice %126 {offsets = [0, 64], sizes = [2, 32], strides = [1, 1]} : vector<2x128xf32> to vector<2x32xf32>
    %130 = vector.extract_strided_slice %125 {offsets = [0, 96], sizes = [2, 32], strides = [1, 1]} : vector<2x128xf32> to vector<2x32xf32>
    %131 = arith.mulf %128, %113 : vector<2x32xf32>
    %132 = arith.mulf %127, %129 : vector<2x32xf32>
    %133 = arith.addf %131, %132 : vector<2x32xf32>
    %134 = math.tanh %133 : vector<2x32xf32>
    %135 = arith.mulf %130, %134 : vector<2x32xf32>
    %c6 = arith.constant 6 : index
    %c0_38 = arith.constant 0 : index
    %c0_39 = arith.constant 0 : index
    %136 = vector.load %arg0[%c6, %c0_38, %c0_39] : memref<8x2x32xf32, #tpu.memory_space<vmem>>, vector<1x2x32xf32>
    %137 = vector.shape_cast %136 : vector<1x2x32xf32> to vector<2x32xf32>
    %138 = tpu.concatenate %137, %135 in 1 : vector<2x32xf32>, vector<2x32xf32> -> vector<2x64xf32>
    %cst_40 = arith.constant dense<0.000000e+00> : vector<2x128xf32>
    %139 = tpu.matmul %138, %1, %cst_40 {dimension_numbers = #tpu.dot_dimension_numbers<[1], [0], [0], [1], [0, 0, 1, 1], [], []>} : vector<2x64xf32>, vector<64x128xf32>, vector<2x128xf32> -> vector<2x128xf32>
    %140 = arith.addf %139, %6 : vector<2x128xf32>
    %141 = arith.negf %140 : vector<2x128xf32>
    %142 = math.exp %141 : vector<2x128xf32>
    %cst_41 = arith.constant 1.000000e+00 : f32
    %143 = vector.broadcast %cst_41 : f32 to vector<2x128xf32>
    %144 = arith.addf %143, %142 : vector<2x128xf32>
    %145 = arith.divf %143, %144 : vector<2x128xf32>
    %146 = math.tanh %140 : vector<2x128xf32>
    %147 = vector.extract_strided_slice %145 {offsets = [0, 0], sizes = [2, 32], strides = [1, 1]} : vector<2x128xf32> to vector<2x32xf32>
    %148 = vector.extract_strided_slice %145 {offsets = [0, 32], sizes = [2, 32], strides = [1, 1]} : vector<2x128xf32> to vector<2x32xf32>
    %149 = vector.extract_strided_slice %146 {offsets = [0, 64], sizes = [2, 32], strides = [1, 1]} : vector<2x128xf32> to vector<2x32xf32>
    %150 = vector.extract_strided_slice %145 {offsets = [0, 96], sizes = [2, 32], strides = [1, 1]} : vector<2x128xf32> to vector<2x32xf32>
    %151 = arith.mulf %148, %133 : vector<2x32xf32>
    %152 = arith.mulf %147, %149 : vector<2x32xf32>
    %153 = arith.addf %151, %152 : vector<2x32xf32>
    %154 = math.tanh %153 : vector<2x32xf32>
    %155 = arith.mulf %150, %154 : vector<2x32xf32>
    %c7 = arith.constant 7 : index
    %c0_42 = arith.constant 0 : index
    %c0_43 = arith.constant 0 : index
    %156 = vector.load %arg0[%c7, %c0_42, %c0_43] : memref<8x2x32xf32, #tpu.memory_space<vmem>>, vector<1x2x32xf32>
    %157 = vector.shape_cast %156 : vector<1x2x32xf32> to vector<2x32xf32>
    %158 = tpu.concatenate %157, %155 in 1 : vector<2x32xf32>, vector<2x32xf32> -> vector<2x64xf32>
    %cst_44 = arith.constant dense<0.000000e+00> : vector<2x128xf32>
    %159 = tpu.matmul %158, %1, %cst_44 {dimension_numbers = #tpu.dot_dimension_numbers<[1], [0], [0], [1], [0, 0, 1, 1], [], []>} : vector<2x64xf32>, vector<64x128xf32>, vector<2x128xf32> -> vector<2x128xf32>
    %160 = arith.addf %159, %6 : vector<2x128xf32>
    %161 = arith.negf %160 : vector<2x128xf32>
    %162 = math.exp %161 : vector<2x128xf32>
    %cst_45 = arith.constant 1.000000e+00 : f32
    %163 = vector.broadcast %cst_45 : f32 to vector<2x128xf32>
    %164 = arith.addf %163, %162 : vector<2x128xf32>
    %165 = arith.divf %163, %164 : vector<2x128xf32>
    %166 = math.tanh %160 : vector<2x128xf32>
    %167 = vector.extract_strided_slice %165 {offsets = [0, 0], sizes = [2, 32], strides = [1, 1]} : vector<2x128xf32> to vector<2x32xf32>
    %168 = vector.extract_strided_slice %165 {offsets = [0, 32], sizes = [2, 32], strides = [1, 1]} : vector<2x128xf32> to vector<2x32xf32>
    %169 = vector.extract_strided_slice %166 {offsets = [0, 64], sizes = [2, 32], strides = [1, 1]} : vector<2x128xf32> to vector<2x32xf32>
    %170 = vector.extract_strided_slice %165 {offsets = [0, 96], sizes = [2, 32], strides = [1, 1]} : vector<2x128xf32> to vector<2x32xf32>
    %171 = arith.mulf %168, %153 : vector<2x32xf32>
    %172 = arith.mulf %167, %169 : vector<2x32xf32>
    %173 = arith.addf %171, %172 : vector<2x32xf32>
    %174 = math.tanh %173 : vector<2x32xf32>
    %175 = arith.mulf %170, %174 : vector<2x32xf32>
    %c7_46 = arith.constant 7 : index
    %c0_47 = arith.constant 0 : index
    %c0_48 = arith.constant 0 : index
    %176 = vector.load %arg0[%c7_46, %c0_47, %c0_48] : memref<8x2x32xf32, #tpu.memory_space<vmem>>, vector<1x2x32xf32>
    %177 = vector.shape_cast %176 : vector<1x2x32xf32> to vector<2x32xf32>
    %178 = tpu.concatenate %177, %175 in 1 : vector<2x32xf32>, vector<2x32xf32> -> vector<2x64xf32>
    %cst_49 = arith.constant dense<0.000000e+00> : vector<2x128xf32>
    %179 = tpu.matmul %178, %3, %cst_49 {dimension_numbers = #tpu.dot_dimension_numbers<[1], [0], [0], [1], [0, 0, 1, 1], [], []>} : vector<2x64xf32>, vector<64x128xf32>, vector<2x128xf32> -> vector<2x128xf32>
    %180 = arith.addf %179, %9 : vector<2x128xf32>
    %181 = arith.negf %180 : vector<2x128xf32>
    %182 = math.exp %181 : vector<2x128xf32>
    %cst_50 = arith.constant 1.000000e+00 : f32
    %183 = vector.broadcast %cst_50 : f32 to vector<2x128xf32>
    %184 = arith.addf %183, %182 : vector<2x128xf32>
    %185 = arith.divf %183, %184 : vector<2x128xf32>
    %186 = math.tanh %180 : vector<2x128xf32>
    %187 = vector.extract_strided_slice %185 {offsets = [0, 0], sizes = [2, 32], strides = [1, 1]} : vector<2x128xf32> to vector<2x32xf32>
    %188 = vector.extract_strided_slice %185 {offsets = [0, 32], sizes = [2, 32], strides = [1, 1]} : vector<2x128xf32> to vector<2x32xf32>
    %189 = vector.extract_strided_slice %186 {offsets = [0, 64], sizes = [2, 32], strides = [1, 1]} : vector<2x128xf32> to vector<2x32xf32>
    %190 = vector.extract_strided_slice %185 {offsets = [0, 96], sizes = [2, 32], strides = [1, 1]} : vector<2x128xf32> to vector<2x32xf32>
    %191 = arith.mulf %188, %173 : vector<2x32xf32>
    %192 = arith.mulf %187, %189 : vector<2x32xf32>
    %193 = arith.addf %191, %192 : vector<2x32xf32>
    %194 = math.tanh %193 : vector<2x32xf32>
    %195 = arith.mulf %190, %194 : vector<2x32xf32>
    %cst_51 = arith.constant dense<0.000000e+00> : vector<2x32xf32>
    %196 = tpu.matmul %195, %10, %cst_51 {dimension_numbers = #tpu.dot_dimension_numbers<[1], [0], [0], [1], [0, 0, 1, 1], [], []>} : vector<2x32xf32>, vector<32x32xf32>, vector<2x32xf32> -> vector<2x32xf32>
    %197 = arith.addf %196, %13 : vector<2x32xf32>
    %198 = tpu.concatenate %197, %195 in 1 : vector<2x32xf32>, vector<2x32xf32> -> vector<2x64xf32>
    %cst_52 = arith.constant dense<0.000000e+00> : vector<2x128xf32>
    %199 = tpu.matmul %198, %3, %cst_52 {dimension_numbers = #tpu.dot_dimension_numbers<[1], [0], [0], [1], [0, 0, 1, 1], [], []>} : vector<2x64xf32>, vector<64x128xf32>, vector<2x128xf32> -> vector<2x128xf32>
    %200 = arith.addf %199, %9 : vector<2x128xf32>
    %201 = arith.negf %200 : vector<2x128xf32>
    %202 = math.exp %201 : vector<2x128xf32>
    %cst_53 = arith.constant 1.000000e+00 : f32
    %203 = vector.broadcast %cst_53 : f32 to vector<2x128xf32>
    %204 = arith.addf %203, %202 : vector<2x128xf32>
    %205 = arith.divf %203, %204 : vector<2x128xf32>
    %206 = math.tanh %200 : vector<2x128xf32>
    %207 = vector.extract_strided_slice %205 {offsets = [0, 0], sizes = [2, 32], strides = [1, 1]} : vector<2x128xf32> to vector<2x32xf32>
    %208 = vector.extract_strided_slice %205 {offsets = [0, 32], sizes = [2, 32], strides = [1, 1]} : vector<2x128xf32> to vector<2x32xf32>
    %209 = vector.extract_strided_slice %206 {offsets = [0, 64], sizes = [2, 32], strides = [1, 1]} : vector<2x128xf32> to vector<2x32xf32>
    %210 = vector.extract_strided_slice %205 {offsets = [0, 96], sizes = [2, 32], strides = [1, 1]} : vector<2x128xf32> to vector<2x32xf32>
    %211 = arith.mulf %208, %193 : vector<2x32xf32>
    %212 = arith.mulf %207, %209 : vector<2x32xf32>
    %213 = arith.addf %211, %212 : vector<2x32xf32>
    %214 = math.tanh %213 : vector<2x32xf32>
    %215 = arith.mulf %210, %214 : vector<2x32xf32>
    %cst_54 = arith.constant dense<0.000000e+00> : vector<2x32xf32>
    %216 = tpu.matmul %215, %10, %cst_54 {dimension_numbers = #tpu.dot_dimension_numbers<[1], [0], [0], [1], [0, 0, 1, 1], [], []>} : vector<2x32xf32>, vector<32x32xf32>, vector<2x32xf32> -> vector<2x32xf32>
    %217 = arith.addf %216, %13 : vector<2x32xf32>
    %218 = tpu.concatenate %217, %215 in 1 : vector<2x32xf32>, vector<2x32xf32> -> vector<2x64xf32>
    %cst_55 = arith.constant dense<0.000000e+00> : vector<2x128xf32>
    %219 = tpu.matmul %218, %3, %cst_55 {dimension_numbers = #tpu.dot_dimension_numbers<[1], [0], [0], [1], [0, 0, 1, 1], [], []>} : vector<2x64xf32>, vector<64x128xf32>, vector<2x128xf32> -> vector<2x128xf32>
    %220 = arith.addf %219, %9 : vector<2x128xf32>
    %221 = arith.negf %220 : vector<2x128xf32>
    %222 = math.exp %221 : vector<2x128xf32>
    %cst_56 = arith.constant 1.000000e+00 : f32
    %223 = vector.broadcast %cst_56 : f32 to vector<2x128xf32>
    %224 = arith.addf %223, %222 : vector<2x128xf32>
    %225 = arith.divf %223, %224 : vector<2x128xf32>
    %226 = math.tanh %220 : vector<2x128xf32>
    %227 = vector.extract_strided_slice %225 {offsets = [0, 0], sizes = [2, 32], strides = [1, 1]} : vector<2x128xf32> to vector<2x32xf32>
    %228 = vector.extract_strided_slice %225 {offsets = [0, 32], sizes = [2, 32], strides = [1, 1]} : vector<2x128xf32> to vector<2x32xf32>
    %229 = vector.extract_strided_slice %226 {offsets = [0, 64], sizes = [2, 32], strides = [1, 1]} : vector<2x128xf32> to vector<2x32xf32>
    %230 = vector.extract_strided_slice %225 {offsets = [0, 96], sizes = [2, 32], strides = [1, 1]} : vector<2x128xf32> to vector<2x32xf32>
    %231 = arith.mulf %228, %213 : vector<2x32xf32>
    %232 = arith.mulf %227, %229 : vector<2x32xf32>
    %233 = arith.addf %231, %232 : vector<2x32xf32>
    %234 = math.tanh %233 : vector<2x32xf32>
    %235 = arith.mulf %230, %234 : vector<2x32xf32>
    %c2_57 = arith.constant 2 : index
    %c0_58 = arith.constant 0 : index
    %c0_59 = arith.constant 0 : index
    %236 = vector.load %arg1[%c2_57, %c0_58, %c0_59] : memref<4x2x32xf32, #tpu.memory_space<vmem>>, vector<1x2x32xf32>
    %237 = vector.shape_cast %236 : vector<1x2x32xf32> to vector<2x32xf32>
    %238 = tpu.concatenate %237, %235 in 1 : vector<2x32xf32>, vector<2x32xf32> -> vector<2x64xf32>
    %cst_60 = arith.constant dense<0.000000e+00> : vector<2x128xf32>
    %239 = tpu.matmul %238, %3, %cst_60 {dimension_numbers = #tpu.dot_dimension_numbers<[1], [0], [0], [1], [0, 0, 1, 1], [], []>} : vector<2x64xf32>, vector<64x128xf32>, vector<2x128xf32> -> vector<2x128xf32>
    %240 = arith.addf %239, %9 : vector<2x128xf32>
    %241 = arith.negf %240 : vector<2x128xf32>
    %242 = math.exp %241 : vector<2x128xf32>
    %cst_61 = arith.constant 1.000000e+00 : f32
    %243 = vector.broadcast %cst_61 : f32 to vector<2x128xf32>
    %244 = arith.addf %243, %242 : vector<2x128xf32>
    %245 = arith.divf %243, %244 : vector<2x128xf32>
    %246 = math.tanh %240 : vector<2x128xf32>
    %247 = vector.extract_strided_slice %245 {offsets = [0, 0], sizes = [2, 32], strides = [1, 1]} : vector<2x128xf32> to vector<2x32xf32>
    %248 = vector.extract_strided_slice %245 {offsets = [0, 32], sizes = [2, 32], strides = [1, 1]} : vector<2x128xf32> to vector<2x32xf32>
    %249 = vector.extract_strided_slice %246 {offsets = [0, 64], sizes = [2, 32], strides = [1, 1]} : vector<2x128xf32> to vector<2x32xf32>
    %250 = vector.extract_strided_slice %245 {offsets = [0, 96], sizes = [2, 32], strides = [1, 1]} : vector<2x128xf32> to vector<2x32xf32>
    %251 = arith.mulf %248, %233 : vector<2x32xf32>
    %252 = arith.mulf %247, %249 : vector<2x32xf32>
    %253 = arith.addf %251, %252 : vector<2x32xf32>
    %254 = math.tanh %253 : vector<2x32xf32>
    %255 = arith.mulf %250, %254 : vector<2x32xf32>
    %256 = tpu.concatenate %195, %215, %235, %255 in 0 : vector<2x32xf32>, vector<2x32xf32>, vector<2x32xf32>, vector<2x32xf32> -> vector<8x32xf32>
    %cst_62 = arith.constant dense<0.000000e+00> : vector<8x32xf32>
    %257 = tpu.matmul %256, %10, %cst_62 {dimension_numbers = #tpu.dot_dimension_numbers<[1], [0], [0], [1], [0, 0, 1, 1], [], []>} : vector<8x32xf32>, vector<32x32xf32>, vector<8x32xf32> -> vector<8x32xf32>
    %c32_63 = arith.constant 32 : index
    %c0_64 = arith.constant 0 : index
    %258 = vector.load %arg4[%c32_63, %c0_64] : memref<33x32xf32, #tpu.memory_space<vmem>>, vector<1x32xf32>
    %259 = vector.shape_cast %258 : vector<1x32xf32> to vector<1x32xf32>
    %260 = vector.broadcast %259 : vector<1x32xf32> to vector<8x32xf32>
    %261 = arith.addf %257, %260 : vector<8x32xf32>
    %c0_65 = arith.constant 0 : index
    %c0_66 = arith.constant 0 : index
    %262 = vector.load %arg5[%c0_65, %c0_66] : memref<8x32xf32, #tpu.memory_space<vmem>>, vector<8x32xf32>
    tpu.vector_store %arg5[%c0_65, %c0_66], %261 {strides = array<i32>} : memref<8x32xf32, #tpu.memory_space<vmem>>, vector<8x32xf32>,
    return
  }
}

</mosaic_0001>

<bundles_post_ra>
// kernel: forward.1
= control target key start
LH: loop header
LB: loop body
LE: loop exit
PB: predicated region body
PF: predicated region fallthrough
CT: control target
= control target key end

     0   :  { %vm48_vm0 = vcmask 261120   ;;  %vm50_vm1 = vcmask 523264   ;;  %s1077_s13 = smov 64   ;;  %s1078_s14 = smov 32   ;;  %s1368_s2 = inlined_call_operand.vmem [shape: f32[2,64,128], index: 2, kind: input, shape index: {}]   ;;  %s1369_s3 = inlined_call_operand.vmem [shape: f32[2,128], index: 3, kind: input, shape index: {}]   ;;  %s1370_s0 = inlined_call_operand.vmem [shape: f32[8,2,32], index: 0, kind: input, shape index: {}]   ;;  %s1371_s4 = inlined_call_operand.vmem [shape: f32[33,32], index: 4, kind: input, shape index: {}]   ;;  %s1372_s1 = inlined_call_operand.vmem [shape: f32[4,2,32], index: 1, kind: input, shape index: {}]   ;;  %s1373_s5 = inlined_call_operand.vmem [shape: f32[8,32], index: 5, kind: output, shape index: {}]  }
   0x1   :  { %v27_v0 = vld [vmem:[%s1368_s2 + $0x38] sm:$0xff]  ;;  %v26_v1 = vld [vmem:[%s1368_s2 + $0x30] sm:$0xff]  ;;  %v25_v2 = vld [vmem:[%s1368_s2 + $0x28] sm:$0xff] }
   0x2   :  { %62 = vmatpush.msra.mxu0 %v27_v0  ;;  %129 = vmatpush.msra.mxu1 %v27_v0  ;;  %v24_v3 = vld [vmem:[%s1368_s2 + $0x20] sm:$0xff]  ;;  %v23_v4 = vld [vmem:[%s1368_s2 + $0x18] sm:$0xff]  ;;  %v22_v5 = vld [vmem:[%s1368_s2 + $0x10] sm:$0xff] }
   0x3   :  { %196 = vmatpush.msra.mxu2 %v27_v0  ;;  %263 = vmatpush.msra.mxu3 %v27_v0  ;;  %v21_v6 = vld [vmem:[%s1368_s2 + $0x8] sm:$0xff]  ;;  %v47_v7 = vld [vmem:[%s1370_s0] sm:$0x3]  ;;  %v943_v35 = vld [vmem:[%s1370_s0 + $0x2] sm:$0x3] }
   0x4   :  { %63 = vmatpush.msra.mxu0 %v26_v1  ;;  %130 = vmatpush.msra.mxu1 %v26_v1  ;;  %v20_v8 = vld [vmem:[%s1368_s2] sm:$0xff]  ;;  %v49_v9 = vsel %vm48_vm0, %v47_v7, 0.0 }
   0x5   :  { %197 = vmatpush.msra.mxu2 %v26_v1  ;;  %264 = vmatpush.msra.mxu3 %v26_v1  ;;  %v1141_v10 = vld [vmem:[%s1369_s3] ss:$0 sm:$0xff]  ;;  %v946_v62 = vld [vmem:[%s1370_s0 + $0x4] sm:$0x3] }
   0x6   :  { %64 = vmatpush.msra.mxu0 %v25_v2  ;;  %131 = vmatpush.msra.mxu1 %v25_v2 }
   0x7   :  { %198 = vmatpush.msra.mxu2 %v25_v2  ;;  %265 = vmatpush.msra.mxu3 %v25_v2 }
   0x8   :  { %65 = vmatpush.msra.mxu0 %v24_v3  ;;  %132 = vmatpush.msra.mxu1 %v24_v3 }
   0x9   :  { %199 = vmatpush.msra.mxu2 %v24_v3  ;;  %266 = vmatpush.msra.mxu3 %v24_v3 }
   0xa   :  { %66 = vmatpush.msra.mxu0 %v23_v4  ;;  %133 = vmatpush.msra.mxu1 %v23_v4 }
   0xb   :  { %200 = vmatpush.msra.mxu2 %v23_v4  ;;  %267 = vmatpush.msra.mxu3 %v23_v4 }
   0xc   :  { %67 = vmatpush.msra.mxu0 %v22_v5  ;;  %134 = vmatpush.msra.mxu1 %v22_v5 }
   0xd   :  { %201 = vmatpush.msra.mxu2 %v22_v5  ;;  %268 = vmatpush.msra.mxu3 %v22_v5 }
   0xe   :  { %68 = vmatpush.msra.mxu0 %v21_v6  ;;  %135 = vmatpush.msra.mxu1 %v21_v6 }
   0xf   :  { %202 = vmatpush.msra.mxu2 %v21_v6  ;;  %269 = vmatpush.msra.mxu3 %v21_v6 }
  0x10   :  { %69 = vmatpush.msra.mxu0 %v20_v8  ;;  %136 = vmatpush.msra.mxu1 %v20_v8 }
  0x11   :  { %941 = vmatmul.msk.f32.vlgmr.msra.gmra.mxu0 %vm50_vm1, %v49_v9  ;;  %203 = vmatpush.msra.mxu2 %v20_v8 }
  0x12   :  { %270 = vmatpush.msra.mxu3 %v20_v8  ;;  %330 = vmatpush.msrb.mxu0 %v27_v0 }
  0x13   :  { %397 = vmatpush.msrb.mxu1 %v27_v0  ;;  %464 = vmatpush.msrb.mxu2 %v27_v0 }
  0x14   :  { %331 = vmatpush.msrb.mxu0 %v26_v1  ;;  %531 = vmatpush.msrb.mxu3 %v27_v0 }
  0x15   :  { %398 = vmatpush.msrb.mxu1 %v26_v1  ;;  %465 = vmatpush.msrb.mxu2 %v26_v1 }
  0x16   :  { %332 = vmatpush.msrb.mxu0 %v25_v2  ;;  %532 = vmatpush.msrb.mxu3 %v26_v1 }
  0x17   :  { %399 = vmatpush.msrb.mxu1 %v25_v2  ;;  %466 = vmatpush.msrb.mxu2 %v25_v2 }
  0x18   :  { %333 = vmatpush.msrb.mxu0 %v24_v3  ;;  %533 = vmatpush.msrb.mxu3 %v25_v2 }
  0x19   :  { %400 = vmatpush.msrb.mxu1 %v24_v3  ;;  %467 = vmatpush.msrb.mxu2 %v24_v3 }
  0x1a   :  { %334 = vmatpush.msrb.mxu0 %v23_v4  ;;  %534 = vmatpush.msrb.mxu3 %v24_v3 }
  0x1b   :  { %401 = vmatpush.msrb.mxu1 %v23_v4  ;;  %468 = vmatpush.msrb.mxu2 %v23_v4 }
  0x1c   :  { %335 = vmatpush.msrb.mxu0 %v22_v5  ;;  %535 = vmatpush.msrb.mxu3 %v23_v4 }
  0x1d   :  { %402 = vmatpush.msrb.mxu1 %v22_v5  ;;  %469 = vmatpush.msrb.mxu2 %v22_v5 }
  0x1e   :  { %336 = vmatpush.msrb.mxu0 %v21_v6  ;;  %536 = vmatpush.msrb.mxu3 %v22_v5 }
  0x1f   :  { %403 = vmatpush.msrb.mxu1 %v21_v6  ;;  %470 = vmatpush.msrb.mxu2 %v21_v6 }
  0x20   :  { %337 = vmatpush.msrb.mxu0 %v20_v8  ;;  %537 = vmatpush.msrb.mxu3 %v21_v6 }
  0x21   :  { %404 = vmatpush.msrb.mxu1 %v20_v8  ;;  %471 = vmatpush.msrb.mxu2 %v20_v8 }
  0x22   :  { %538 = vmatpush.msrb.mxu3 %v20_v8 }
  0x8e   :  { %v71_v11 = vpop.f32.mrf.mxu0 }
  0x8f   :  { %v72_v12 = vadd.f32 %v1141_v10, %v71_v11 }
  0x91   :  { %981 = vtanh.f32 %v72_v12  ;;  %v942_v14 = vmul.f32 -1.442695, %v72_v12 }
  0x93   :  { %983 = vpow2.f32 %v942_v14 }
  0x97   :  { %v982_v13 = vpop.eup %981 }
  0x98   :  { %96 = vrot.lane.b32.xlu0 %v982_v13, %s1077_s13 }
  0x99   :  { %v984_v15 = vpop.eup %983 }
  0x9a   :  { %v77_v16 = vadd.f32 1.0, %v984_v15 }
  0x9c   :  { %985 = vrcp.f32 %v77_v16  ;;  %v89_v22 = vand.u32 2147483648, %v77_v16  ;;  %vm83_vm3 = vweird.f32 %v77_v16  ;;  %v87_v23 = vand.u32 2147483647, %v77_v16 }
  0x9e   :  { %v90_v25 = vor.u32 1.1754944e-38, %v89_v22  ;;  %vm88_vm5 = vcmp.eq.f32.partialorder %v87_v23, 8.507059e+37 }
  0xa2   :  { %v986_v17 = vpop.eup %985 }
  0xa3   :  { %v79_v18 = vmul.f32 %v986_v17, %v77_v16  ;;  %vm84_vm2 = vweird.f32 %v986_v17 }
  0xa4   :  { %vm85_vm4 = vmor %vm83_vm3, %vm84_vm2 }
  0xa5   :  { %v80_v19 = vsub.f32 1.0, %v79_v18 }
  0xa7   :  { %v81_v20 = vmul.f32 %v986_v17, %v80_v19 }
  0xa9   :  { %v82_v21 = vadd.f32 %v986_v17, %v81_v20 }
  0xab   :  { %v86_v24 = vsel %vm85_vm4, %v986_v17, %v82_v21 }
  0xac   :  { %v91_v27 = vsel %vm88_vm5, %v90_v25, %v86_v24 }
  0xad   :  { %v94_v29 = vmul.f32 0.0, %v91_v27 }
 0x10a   :  { %v97_v26 = vpop.permute.xlu0 %96 }
 0x10b   :  { %v99_v28 = vmul.f32 %v97_v26, %v91_v27  ;;  %v949_v26 = vld [vmem:[%s1370_s0 + $0x6] sm:$0x3] }
 0x10d   :  { %101 = vrot.lane.b32.xlu0 %v99_v28, %s1078_s14 }
 0x17f   :  { %v102_v30 = vpop.permute.xlu0 %101 }
 0x180   :  { %v104_v31 = vadd.f32 %v102_v30, %v94_v29 }
 0x182   :  { %987 = vtanh.f32 %v104_v31 }
 0x188   :  { %v988_v32 = vpop.eup %987 }
 0x189   :  { %107 = vrot.lane.b32.xlu1 %v988_v32, %s1077_s13 }
 0x1fb   :  { %v108_v33 = vpop.permute.xlu1 %107 }
 0x1fc   :  { %v110_v34 = vmul.f32 %v108_v33, %v91_v27 }
 0x1fe   :  { %114 = vrot.lane.b32.xlu1 %v110_v34, %s1077_s13 }
 0x270   :  { %v115_v36 = vpop.permute.xlu1 %114 }
 0x271   :  { %v117_v37 = vsel %vm48_vm0, %v943_v35, %v115_v36 }
 0x272   :  { %944 = vmatmul.msk.f32.vlgmr.msra.gmra.mxu1 %vm50_vm1, %v117_v37 }
 0x2ef   :  { %v138_v38 = vpop.f32.mrf.mxu1 }
 0x2f0   :  { %v139_v39 = vadd.f32 %v1141_v10, %v138_v38 }
 0x2f2   :  { %989 = vtanh.f32 %v139_v39  ;;  %v945_v41 = vmul.f32 -1.442695, %v139_v39 }
 0x2f4   :  { %991 = vpow2.f32 %v945_v41 }
 0x2f8   :  { %v990_v40 = vpop.eup %989 }
 0x2f9   :  { %163 = vrot.lane.b32.xlu2 %v990_v40, %s1077_s13 }
 0x2fa   :  { %v992_v42 = vpop.eup %991 }
 0x2fb   :  { %v144_v43 = vadd.f32 1.0, %v992_v42 }
 0x2fd   :  { %993 = vrcp.f32 %v144_v43  ;;  %v156_v49 = vand.u32 2147483648, %v144_v43  ;;  %vm150_vm7 = vweird.f32 %v144_v43  ;;  %v154_v50 = vand.u32 2147483647, %v144_v43 }
 0x2ff   :  { %v157_v52 = vor.u32 1.1754944e-38, %v156_v49  ;;  %vm155_vm9 = vcmp.eq.f32.partialorder %v154_v50, 8.507059e+37 }
 0x303   :  { %v994_v44 = vpop.eup %993 }
 0x304   :  { %v146_v45 = vmul.f32 %v994_v44, %v144_v43  ;;  %vm151_vm6 = vweird.f32 %v994_v44 }
 0x305   :  { %vm152_vm8 = vmor %vm150_vm7, %vm151_vm6 }
 0x306   :  { %v147_v46 = vsub.f32 1.0, %v146_v45 }
 0x308   :  { %v148_v47 = vmul.f32 %v994_v44, %v147_v46 }
 0x30a   :  { %v149_v48 = vadd.f32 %v994_v44, %v148_v47 }
 0x30c   :  { %v153_v51 = vsel %vm152_vm8, %v994_v44, %v149_v48 }
 0x30d   :  { %v158_v54 = vsel %vm155_vm9, %v157_v52, %v153_v51 }
 0x30e   :  { %v161_v56 = vmul.f32 %v158_v54, %v104_v31 }
 0x353   :  { %v164_v53 = vpop.permute.xlu2 %163 }
 0x354   :  { %v166_v55 = vmul.f32 %v164_v53, %v158_v54  ;;  %v952_v53 = vld [vmem:[%s1370_s0 + $0x8] sm:$0x3] }
 0x356   :  { %168 = vrot.lane.b32.xlu2 %v166_v55, %s1078_s14 }
 0x3b0   :  { %v169_v57 = vpop.permute.xlu2 %168 }
 0x3b1   :  { %v171_v58 = vadd.f32 %v169_v57, %v161_v56 }
 0x3b3   :  { %995 = vtanh.f32 %v171_v58 }
 0x3b9   :  { %v996_v59 = vpop.eup %995 }
 0x3ba   :  { %174 = vrot.lane.b32.xlu0 %v996_v59, %s1077_s13 }
 0x42c   :  { %v175_v60 = vpop.permute.xlu0 %174 }
 0x42d   :  { %v177_v61 = vmul.f32 %v175_v60, %v158_v54 }
 0x42f   :  { %181 = vrot.lane.b32.xlu1 %v177_v61, %s1077_s13 }
 0x4a1   :  { %v182_v63 = vpop.permute.xlu1 %181 }
 0x4a2   :  { %v184_v0 = vsel %vm48_vm0, %v946_v62, %v182_v63 }
 0x4a3   :  { %947 = vmatmul.msk.f32.vlgmr.msra.gmra.mxu2 %vm50_vm1, %v184_v0 }
 0x526   :  { %v205_v1 = vpop.f32.mrf.mxu2 }
 0x527   :  { %v206_v2 = vadd.f32 %v1141_v10, %v205_v1 }
 0x529   :  { %997 = vtanh.f32 %v206_v2  ;;  %v948_v4 = vmul.f32 -1.442695, %v206_v2 }
 0x52b   :  { %999 = vpow2.f32 %v948_v4 }
 0x52f   :  { %v998_v3 = vpop.eup %997 }
 0x530   :  { %230 = vrot.lane.b32.xlu2 %v998_v3, %s1077_s13 }
 0x531   :  { %v1000_v5 = vpop.eup %999 }
 0x532   :  { %v211_v6 = vadd.f32 1.0, %v1000_v5 }
 0x534   :  { %1001 = vrcp.f32 %v211_v6  ;;  %v223_v13 = vand.u32 2147483648, %v211_v6  ;;  %vm217_vm11 = vweird.f32 %v211_v6  ;;  %v221_v14 = vand.u32 2147483647, %v211_v6 }
 0x536   :  { %v224_v16 = vor.u32 1.1754944e-38, %v223_v13  ;;  %vm222_vm13 = vcmp.eq.f32.partialorder %v221_v14, 8.507059e+37 }
 0x53a   :  { %v1002_v7 = vpop.eup %1001 }
 0x53b   :  { %v213_v8 = vmul.f32 %v1002_v7, %v211_v6  ;;  %vm218_vm10 = vweird.f32 %v1002_v7 }
 0x53c   :  { %vm219_vm12 = vmor %vm217_vm11, %vm218_vm10 }
 0x53d   :  { %v214_v9 = vsub.f32 1.0, %v213_v8 }
 0x53f   :  { %v215_v11 = vmul.f32 %v1002_v7, %v214_v9 }
 0x541   :  { %v216_v12 = vadd.f32 %v1002_v7, %v215_v11 }
 0x543   :  { %v220_v15 = vsel %vm219_vm12, %v1002_v7, %v216_v12 }
 0x544   :  { %v225_v18 = vsel %vm222_vm13, %v224_v16, %v220_v15 }
 0x545   :  { %v228_v20 = vmul.f32 %v225_v18, %v171_v58 }
 0x58a   :  { %v231_v17 = vpop.permute.xlu2 %230 }
 0x58b   :  { %v233_v19 = vmul.f32 %v231_v17, %v225_v18  ;;  %v955_v17 = vld [vmem:[%s1370_s0 + $0xa] sm:$0x3] }
 0x58d   :  { %235 = vrot.lane.b32.xlu0 %v233_v19, %s1078_s14 }
 0x5ff   :  { %v236_v21 = vpop.permute.xlu0 %235 }
 0x600   :  { %v238_v22 = vadd.f32 %v236_v21, %v228_v20 }
 0x602   :  { %1003 = vtanh.f32 %v238_v22 }
 0x608   :  { %v1004_v23 = vpop.eup %1003 }
 0x609   :  { %241 = vrot.lane.b32.xlu1 %v1004_v23, %s1077_s13 }
 0x67b   :  { %v242_v24 = vpop.permute.xlu1 %241 }
 0x67c   :  { %v244_v25 = vmul.f32 %v242_v24, %v225_v18 }
 0x67e   :  { %248 = vrot.lane.b32.xlu2 %v244_v25, %s1077_s13 }
 0x6d8   :  { %v249_v27 = vpop.permute.xlu2 %248 }
 0x6d9   :  { %v251_v28 = vsel %vm48_vm0, %v949_v26, %v249_v27 }
 0x6da   :  { %950 = vmatmul.msk.f32.vlgmr.msra.gmra.mxu3 %vm50_vm1, %v251_v28 }
 0x75d   :  { %v272_v29 = vpop.f32.mrf.mxu3 }
 0x75e   :  { %v273_v30 = vadd.f32 %v1141_v10, %v272_v29 }
 0x760   :  { %1005 = vtanh.f32 %v273_v30  ;;  %v951_v32 = vmul.f32 -1.442695, %v273_v30 }
 0x762   :  { %1007 = vpow2.f32 %v951_v32 }
 0x766   :  { %v1006_v31 = vpop.eup %1005 }
 0x767   :  { %297 = vrot.lane.b32.xlu0 %v1006_v31, %s1077_s13 }
 0x768   :  { %v1008_v33 = vpop.eup %1007 }
 0x769   :  { %v278_v34 = vadd.f32 1.0, %v1008_v33 }
 0x76b   :  { %1009 = vrcp.f32 %v278_v34  ;;  %v290_v40 = vand.u32 2147483648, %v278_v34  ;;  %vm284_vm15 = vweird.f32 %v278_v34  ;;  %v288_v41 = vand.u32 2147483647, %v278_v34 }
 0x76d   :  { %v291_v43 = vor.u32 1.1754944e-38, %v290_v40  ;;  %vm289_vm3 = vcmp.eq.f32.partialorder %v288_v41, 8.507059e+37 }
 0x771   :  { %v1010_v35 = vpop.eup %1009 }
 0x772   :  { %v280_v36 = vmul.f32 %v1010_v35, %v278_v34  ;;  %vm285_vm14 = vweird.f32 %v1010_v35 }
 0x773   :  { %vm286_vm2 = vmor %vm284_vm15, %vm285_vm14 }
 0x774   :  { %v281_v37 = vsub.f32 1.0, %v280_v36 }
 0x776   :  { %v282_v38 = vmul.f32 %v1010_v35, %v281_v37 }
 0x778   :  { %v283_v39 = vadd.f32 %v1010_v35, %v282_v38 }
 0x77a   :  { %v287_v42 = vsel %vm286_vm2, %v1010_v35, %v283_v39 }
 0x77b   :  { %v292_v45 = vsel %vm289_vm3, %v291_v43, %v287_v42 }
 0x77c   :  { %v295_v47 = vmul.f32 %v292_v45, %v238_v22 }
 0x7d9   :  { %v298_v44 = vpop.permute.xlu0 %297 }
 0x7da   :  { %v300_v46 = vmul.f32 %v298_v44, %v292_v45  ;;  %v958_v44 = vld [vmem:[%s1370_s0 + $0xc] sm:$0x3] }
 0x7dc   :  { %302 = vrot.lane.b32.xlu1 %v300_v46, %s1078_s14 }
 0x84e   :  { %v303_v48 = vpop.permute.xlu1 %302 }
 0x84f   :  { %v305_v49 = vadd.f32 %v303_v48, %v295_v47 }
 0x851   :  { %1011 = vtanh.f32 %v305_v49 }
 0x857   :  { %v1012_v50 = vpop.eup %1011 }
 0x858   :  { %308 = vrot.lane.b32.xlu2 %v1012_v50, %s1077_s13 }
 0x8b2   :  { %v309_v51 = vpop.permute.xlu2 %308 }
 0x8b3   :  { %v311_v52 = vmul.f32 %v309_v51, %v292_v45 }
 0x8b5   :  { %315 = vrot.lane.b32.xlu0 %v311_v52, %s1077_s13 }
 0x927   :  { %v316_v54 = vpop.permute.xlu0 %315 }
 0x928   :  { %v318_v55 = vsel %vm48_vm0, %v952_v53, %v316_v54 }
 0x929   :  { %953 = vmatmul.msk.f32.vlgmr.msrb.gmra.mxu0 %vm50_vm1, %v318_v55 }
 0x9a6   :  { %v339_v56 = vpop.f32.mrf.mxu0 }
 0x9a7   :  { %v340_v57 = vadd.f32 %v1141_v10, %v339_v56 }
 0x9a9   :  { %1013 = vtanh.f32 %v340_v57  ;;  %v954_v59 = vmul.f32 -1.442695, %v340_v57 }
 0x9ab   :  { %1015 = vpow2.f32 %v954_v59 }
 0x9af   :  { %v1014_v58 = vpop.eup %1013 }
 0x9b0   :  { %364 = vrot.lane.b32.xlu1 %v1014_v58, %s1077_s13 }
 0x9b1   :  { %v1016_v60 = vpop.eup %1015 }
 0x9b2   :  { %v345_v61 = vadd.f32 1.0, %v1016_v60 }
 0x9b4   :  { %1017 = vrcp.f32 %v345_v61  ;;  %v357_v3 = vand.u32 2147483648, %v345_v61  ;;  %vm351_vm5 = vweird.f32 %v345_v61  ;;  %v355_v4 = vand.u32 2147483647, %v345_v61 }
 0x9b6   :  { %v358_v6 = vor.u32 1.1754944e-38, %v357_v3  ;;  %vm356_vm7 = vcmp.eq.f32.partialorder %v355_v4, 8.507059e+37 }
 0x9ba   :  { %v1018_v62 = vpop.eup %1017 }
 0x9bb   :  { %v347_v63 = vmul.f32 %v1018_v62, %v345_v61  ;;  %vm352_vm4 = vweird.f32 %v1018_v62 }
 0x9bc   :  { %vm353_vm6 = vmor %vm351_vm5, %vm352_vm4 }
 0x9bd   :  { %v348_v0 = vsub.f32 1.0, %v347_v63 }
 0x9bf   :  { %v349_v1 = vmul.f32 %v1018_v62, %v348_v0 }
 0x9c1   :  { %v350_v2 = vadd.f32 %v1018_v62, %v349_v1 }
 0x9c3   :  { %v354_v5 = vsel %vm353_vm6, %v1018_v62, %v350_v2 }
 0x9c4   :  { %v359_v8 = vsel %vm356_vm7, %v358_v6, %v354_v5 }
 0x9c5   :  { %v362_v11 = vmul.f32 %v359_v8, %v305_v49 }
 0xa22   :  { %v365_v7 = vpop.permute.xlu1 %364 }
 0xa23   :  { %v367_v9 = vmul.f32 %v365_v7, %v359_v8  ;;  %v1211_v7 = vld [vmem:[%s1370_s0 + $0xe] sm:$0x3] }
 0xa25   :  { %369 = vrot.lane.b32.xlu2 %v367_v9, %s1078_s14 }
 0xa7f   :  { %v370_v12 = vpop.permute.xlu2 %369 }
 0xa80   :  { %v372_v13 = vadd.f32 %v370_v12, %v362_v11 }
 0xa82   :  { %1019 = vtanh.f32 %v372_v13 }
 0xa88   :  { %v1020_v14 = vpop.eup %1019 }
 0xa89   :  { %375 = vrot.lane.b32.xlu0 %v1020_v14, %s1077_s13 }
 0xafb   :  { %v376_v15 = vpop.permute.xlu0 %375 }
 0xafc   :  { %v378_v16 = vmul.f32 %v376_v15, %v359_v8 }
 0xafe   :  { %382 = vrot.lane.b32.xlu1 %v378_v16, %s1077_s13 }
 0xb70   :  { %v383_v18 = vpop.permute.xlu1 %382 }
 0xb71   :  { %v385_v19 = vsel %vm48_vm0, %v955_v17, %v383_v18 }
 0xb72   :  { %956 = vmatmul.msk.f32.vlgmr.msrb.gmra.mxu1 %vm50_vm1, %v385_v19 }
 0xbef   :  { %v406_v20 = vpop.f32.mrf.mxu1 }
 0xbf0   :  { %v407_v21 = vadd.f32 %v1141_v10, %v406_v20 }
 0xbf2   :  { %1021 = vtanh.f32 %v407_v21  ;;  %v957_v23 = vmul.f32 -1.442695, %v407_v21 }
 0xbf4   :  { %1023 = vpow2.f32 %v957_v23 }
 0xbf8   :  { %v1022_v22 = vpop.eup %1021 }
 0xbf9   :  { %431 = vrot.lane.b32.xlu2 %v1022_v22, %s1077_s13 }
 0xbfa   :  { %v1024_v24 = vpop.eup %1023 }
 0xbfb   :  { %v412_v25 = vadd.f32 1.0, %v1024_v24 }
 0xbfd   :  { %1025 = vrcp.f32 %v412_v25  ;;  %v424_v31 = vand.u32 2147483648, %v412_v25  ;;  %vm418_vm9 = vweird.f32 %v412_v25  ;;  %v422_v32 = vand.u32 2147483647, %v412_v25 }
 0xbff   :  { %v425_v34 = vor.u32 1.1754944e-38, %v424_v31  ;;  %vm423_vm11 = vcmp.eq.f32.partialorder %v422_v32, 8.507059e+37  ;;  %v1223_v32 = vld [vmem:[%s1368_s2 + $0x78] sm:$0xff] }
 0xc00   :  { %596 = vmatpush.msra.mxu0 %v1223_v32  ;;  %685 = vmatpush.msra.mxu2 %v1223_v32 }
 0xc03   :  { %v1026_v26 = vpop.eup %1025 }
 0xc04   :  { %v414_v27 = vmul.f32 %v1026_v26, %v412_v25  ;;  %vm419_vm8 = vweird.f32 %v1026_v26 }
 0xc05   :  { %vm420_vm10 = vmor %vm418_vm9, %vm419_vm8 }
 0xc06   :  { %v415_v28 = vsub.f32 1.0, %v414_v27 }
 0xc08   :  { %v416_v29 = vmul.f32 %v1026_v26, %v415_v28 }
 0xc0a   :  { %v417_v30 = vadd.f32 %v1026_v26, %v416_v29 }
 0xc0c   :  { %v421_v33 = vsel %vm420_vm10, %v1026_v26, %v417_v30 }
 0xc0d   :  { %v426_v36 = vsel %vm423_vm11, %v425_v34, %v421_v33  ;;  %v1228_v33 = vld [vmem:[%s1368_s2 + $0x70] sm:$0xff]  ;;  %v1235_v34 = vld [vmem:[%s1368_s2 + $0x68] sm:$0xff] }
 0xc0e   :  { %v429_v38 = vmul.f32 %v426_v36, %v372_v13  ;;  %597 = vmatpush.msra.mxu0 %v1228_v33  ;;  %686 = vmatpush.msra.mxu2 %v1228_v33 }
 0xc10   :  { %598 = vmatpush.msra.mxu0 %v1235_v34  ;;  %687 = vmatpush.msra.mxu2 %v1235_v34 }
 0xc53   :  { %v432_v35 = vpop.permute.xlu2 %431 }
 0xc54   :  { %v434_v37 = vmul.f32 %v432_v35, %v426_v36  ;;  %v1242_v35 = vld [vmem:[%s1368_s2 + $0x60] sm:$0xff] }
 0xc55   :  { %599 = vmatpush.msra.mxu0 %v1242_v35  ;;  %688 = vmatpush.msra.mxu2 %v1242_v35 }
 0xc56   :  { %436 = vrot.lane.b32.xlu0 %v434_v37, %s1078_s14  ;;  %v1256_v37 = vld [vmem:[%s1368_s2 + $0x50] sm:$0xff] }
 0xcc8   :  { %v437_v39 = vpop.permute.xlu0 %436 }
 0xcc9   :  { %v439_v40 = vadd.f32 %v437_v39, %v429_v38  ;;  %v1263_v38 = vld [vmem:[%s1368_s2 + $0x48] sm:$0xff] }
 0xccb   :  { %1027 = vtanh.f32 %v439_v40 }
 0xcd1   :  { %v1028_v41 = vpop.eup %1027 }
 0xcd2   :  { %442 = vrot.lane.b32.xlu1 %v1028_v41, %s1077_s13  ;;  %v1273_v41 = vld [vmem:[%s1368_s2 + $0x40] sm:$0xff] }
 0xd44   :  { %v443_v42 = vpop.permute.xlu1 %442 }
 0xd45   :  { %v445_v43 = vmul.f32 %v443_v42, %v426_v36  ;;  %v1249_v36 = vld [vmem:[%s1368_s2 + $0x58] sm:$0xff] }
 0xd46   :  { %600 = vmatpush.msra.mxu0 %v1249_v36  ;;  %689 = vmatpush.msra.mxu2 %v1249_v36 }
 0xd47   :  { %449 = vrot.lane.b32.xlu2 %v445_v43, %s1077_s13 }
 0xd48   :  { %601 = vmatpush.msra.mxu0 %v1256_v37  ;;  %690 = vmatpush.msra.mxu2 %v1256_v37 }
 0xd4a   :  { %602 = vmatpush.msra.mxu0 %v1263_v38  ;;  %691 = vmatpush.msra.mxu2 %v1263_v38 }
 0xd4c   :  { %603 = vmatpush.msra.mxu0 %v1273_v41  ;;  %692 = vmatpush.msra.mxu2 %v1273_v41 }
 0xda1   :  { %v450_v45 = vpop.permute.xlu2 %449 }
 0xda2   :  { %v452_v46 = vsel %vm48_vm0, %v958_v44, %v450_v45  ;;  %v1283_v44 = vld [vmem:[%s1369_s3 + $0x1] ss:$0 sm:$0xff] }
 0xda3   :  { %959 = vmatmul.msk.f32.vlgmr.msrb.gmra.mxu2 %vm50_vm1, %v452_v46 }
 0xe26   :  { %v473_v47 = vpop.f32.mrf.mxu2 }
 0xe27   :  { %v474_v48 = vadd.f32 %v1141_v10, %v473_v47 }
 0xe29   :  { %1029 = vtanh.f32 %v474_v48  ;;  %v960_v50 = vmul.f32 -1.442695, %v474_v48 }
 0xe2b   :  { %1031 = vpow2.f32 %v960_v50 }
 0xe2f   :  { %v1030_v49 = vpop.eup %1029 }
 0xe30   :  { %498 = vrot.lane.b32.xlu0 %v1030_v49, %s1077_s13 }
 0xe31   :  { %v1032_v51 = vpop.eup %1031 }
 0xe32   :  { %v479_v52 = vadd.f32 1.0, %v1032_v51 }
 0xe34   :  { %1033 = vrcp.f32 %v479_v52  ;;  %v491_v58 = vand.u32 2147483648, %v479_v52  ;;  %vm485_vm13 = vweird.f32 %v479_v52  ;;  %v489_v59 = vand.u32 2147483647, %v479_v52 }
 0xe36   :  { %v492_v61 = vor.u32 1.1754944e-38, %v491_v58  ;;  %vm490_vm15 = vcmp.eq.f32.partialorder %v489_v59, 8.507059e+37 }
 0xe3a   :  { %v1034_v53 = vpop.eup %1033 }
 0xe3b   :  { %v481_v54 = vmul.f32 %v1034_v53, %v479_v52  ;;  %vm486_vm12 = vweird.f32 %v1034_v53 }
 0xe3c   :  { %vm487_vm14 = vmor %vm485_vm13, %vm486_vm12 }
 0xe3d   :  { %v482_v55 = vsub.f32 1.0, %v481_v54 }
 0xe3f   :  { %v483_v56 = vmul.f32 %v1034_v53, %v482_v55 }
 0xe41   :  { %v484_v57 = vadd.f32 %v1034_v53, %v483_v56 }
 0xe43   :  { %v488_v60 = vsel %vm487_vm14, %v1034_v53, %v484_v57 }
 0xe44   :  { %v493_v63 = vsel %vm490_vm15, %v492_v61, %v488_v60 }
 0xe45   :  { %v496_v1 = vmul.f32 %v493_v63, %v439_v40 }
 0xea2   :  { %v499_v62 = vpop.permute.xlu0 %498 }
 0xea3   :  { %v501_v0 = vmul.f32 %v499_v62, %v493_v63 }
 0xea5   :  { %503 = vrot.lane.b32.xlu1 %v501_v0, %s1078_s14 }
 0xf17   :  { %v504_v2 = vpop.permute.xlu1 %503 }
 0xf18   :  { %v506_v3 = vadd.f32 %v504_v2, %v496_v1 }
 0xf1a   :  { %1035 = vtanh.f32 %v506_v3 }
 0xf20   :  { %v1036_v4 = vpop.eup %1035 }
 0xf21   :  { %509 = vrot.lane.b32.xlu2 %v1036_v4, %s1077_s13  ;;  %v43_v4 = vld [vmem:[%s1371_s4 + $0x10] sm:$0xff] }
 0xf7b   :  { %v510_v5 = vpop.permute.xlu2 %509 }
 0xf7c   :  { %v512_v6 = vmul.f32 %v510_v5, %v493_v63  ;;  %v42_v5 = vld [vmem:[%s1371_s4 + $0x8] sm:$0xff] }
 0xf7e   :  { %516 = vrot.lane.b32.xlu0 %v512_v6, %s1077_s13  ;;  %v41_v6 = vld [vmem:[%s1371_s4] sm:$0xff] }
 0xff0   :  { %v517_v8 = vpop.permute.xlu0 %516 }
 0xff1   :  { %v519_v9 = vsel %vm48_vm0, %v1211_v7, %v517_v8 }
 0xff2   :  { %962 = vmatmul.msk.f32.vlgmr.msrb.gmra.mxu3 %vm50_vm1, %v519_v9 }
0x1075   :  { %v540_v11 = vpop.f32.mrf.mxu3 }
0x1076   :  { %v541_v12 = vadd.f32 %v1141_v10, %v540_v11  ;;  %v1330_v11 = vld [vmem:[%s1371_s4 + $0x20] ss:$0 sm:$0xff] }
0x1078   :  { %1037 = vtanh.f32 %v541_v12  ;;  %v963_v14 = vmul.f32 -1.442695, %v541_v12 }
0x107a   :  { %1039 = vpow2.f32 %v963_v14 }
0x107e   :  { %v1038_v13 = vpop.eup %1037 }
0x107f   :  { %565 = vrot.lane.b32.xlu1 %v1038_v13, %s1077_s13 }
0x1080   :  { %v1040_v15 = vpop.eup %1039 }
0x1081   :  { %v546_v16 = vadd.f32 1.0, %v1040_v15 }
0x1083   :  { %1041 = vrcp.f32 %v546_v16  ;;  %v558_v22 = vand.u32 2147483648, %v546_v16  ;;  %vm552_vm3 = vweird.f32 %v546_v16  ;;  %v556_v23 = vand.u32 2147483647, %v546_v16 }
0x1085   :  { %v559_v24 = vor.u32 1.1754944e-38, %v558_v22  ;;  %vm557_vm5 = vcmp.eq.f32.partialorder %v556_v23, 8.507059e+37 }
0x1089   :  { %v1042_v17 = vpop.eup %1041 }
0x108a   :  { %v548_v18 = vmul.f32 %v1042_v17, %v546_v16  ;;  %vm553_vm2 = vweird.f32 %v1042_v17 }
0x108b   :  { %vm554_vm4 = vmor %vm552_vm3, %vm553_vm2 }
0x108c   :  { %v549_v19 = vsub.f32 1.0, %v548_v18 }
0x108e   :  { %v550_v20 = vmul.f32 %v1042_v17, %v549_v19 }
0x1090   :  { %v551_v21 = vadd.f32 %v1042_v17, %v550_v20 }
0x1092   :  { %v555_v10 = vsel %vm554_vm4, %v1042_v17, %v551_v21  ;;  %vm897_vm4 = vcmask 1041408  }
0x1093   :  { %v560_v26 = vsel %vm557_vm5, %v559_v24, %v555_v10  ;;  %vm899_vm5 = vcmask 1043456  }
0x1094   :  { %v563_v28 = vmul.f32 %v560_v26, %v506_v3  ;;  %v44_v3 = vld [vmem:[%s1371_s4 + $0x18] sm:$0xff] }
0x1095   :  { %662 = vmatpush.msra.mxu1 %v44_v3  ;;  %751 = vmatpush.msra.mxu3 %v44_v3 }
0x1096   :  { %920 = vmatpush.msrb.mxu0 %v44_v3 }
0x1097   :  { %663 = vmatpush.msra.mxu1 %v43_v4  ;;  %752 = vmatpush.msra.mxu3 %v43_v4 }
0x1098   :  { %921 = vmatpush.msrb.mxu0 %v43_v4 }
0x1099   :  { %664 = vmatpush.msra.mxu1 %v42_v5  ;;  %753 = vmatpush.msra.mxu3 %v42_v5 }
0x109a   :  { %922 = vmatpush.msrb.mxu0 %v42_v5 }
0x109b   :  { %665 = vmatpush.msra.mxu1 %v41_v6  ;;  %754 = vmatpush.msra.mxu3 %v41_v6 }
0x109c   :  { %923 = vmatpush.msrb.mxu0 %v41_v6 }
0x109d   :  { %774 = vmatpush.msrb.mxu1 %v1223_v32  ;;  %841 = vmatpush.msrb.mxu3 %v1223_v32 }
0x109f   :  { %775 = vmatpush.msrb.mxu1 %v1228_v33  ;;  %842 = vmatpush.msrb.mxu3 %v1228_v33 }
0x10a1   :  { %776 = vmatpush.msrb.mxu1 %v1235_v34  ;;  %843 = vmatpush.msrb.mxu3 %v1235_v34 }
0x10a3   :  { %777 = vmatpush.msrb.mxu1 %v1242_v35  ;;  %844 = vmatpush.msrb.mxu3 %v1242_v35 }
0x10a5   :  { %778 = vmatpush.msrb.mxu1 %v1249_v36  ;;  %845 = vmatpush.msrb.mxu3 %v1249_v36 }
0x10a7   :  { %779 = vmatpush.msrb.mxu1 %v1256_v37  ;;  %846 = vmatpush.msrb.mxu3 %v1256_v37 }
0x10a9   :  { %780 = vmatpush.msrb.mxu1 %v1263_v38  ;;  %847 = vmatpush.msrb.mxu3 %v1263_v38 }
0x10ab   :  { %781 = vmatpush.msrb.mxu1 %v1273_v41  ;;  %848 = vmatpush.msrb.mxu3 %v1273_v41 }
0x10f1   :  { %v566_v25 = vpop.permute.xlu1 %565 }
0x10f2   :  { %v568_v27 = vmul.f32 %v566_v25, %v560_v26 }
0x10f4   :  { %570 = vrot.lane.b32.xlu2 %v568_v27, %s1078_s14 }
0x114e   :  { %v571_v29 = vpop.permute.xlu2 %570 }
0x114f   :  { %v573_v30 = vadd.f32 %v571_v29, %v563_v28 }
0x1151   :  { %1043 = vtanh.f32 %v573_v30 }
0x1157   :  { %v1044_v31 = vpop.eup %1043 }
0x1158   :  { %576 = vrot.lane.b32.xlu0 %v1044_v31, %s1077_s13 }
0x11ca   :  { %v577_v39 = vpop.permute.xlu0 %576 }
0x11cb   :  { %v579_v40 = vmul.f32 %v577_v39, %v560_v26 }
0x11cd   :  { %581 = vrot.lane.b32.xlu1 %v579_v40, %s1077_s13 }
0x123f   :  { %v582_v42 = vpop.permute.xlu1 %581 }
0x1240   :  { %v584_v43 = vsel %vm48_vm0, %v1211_v7, %v582_v42 }
0x1241   :  { %964 = vmatmul.msk.f32.vlgmr.msra.gmra.mxu0 %vm50_vm1, %v584_v43 }
0x12be   :  { %v605_v45 = vpop.f32.mrf.mxu0 }
0x12bf   :  { %v606_v46 = vadd.f32 %v1283_v44, %v605_v45 }
0x12c1   :  { %1045 = vtanh.f32 %v606_v46  ;;  %v965_v48 = vmul.f32 -1.442695, %v606_v46 }
0x12c3   :  { %1047 = vpow2.f32 %v965_v48 }
0x12c7   :  { %v1046_v47 = vpop.eup %1045 }
0x12c8   :  { %630 = vrot.lane.b32.xlu2 %v1046_v47, %s1077_s13 }
0x12c9   :  { %v1048_v49 = vpop.eup %1047 }
0x12ca   :  { %v611_v50 = vadd.f32 1.0, %v1048_v49 }
0x12cc   :  { %1049 = vrcp.f32 %v611_v50  ;;  %v623_v56 = vand.u32 2147483648, %v611_v50  ;;  %vm617_vm7 = vweird.f32 %v611_v50  ;;  %v621_v57 = vand.u32 2147483647, %v611_v50 }
0x12ce   :  { %v624_v59 = vor.u32 1.1754944e-38, %v623_v56  ;;  %vm622_vm9 = vcmp.eq.f32.partialorder %v621_v57, 8.507059e+37 }
0x12d2   :  { %v1050_v51 = vpop.eup %1049 }
0x12d3   :  { %v613_v52 = vmul.f32 %v1050_v51, %v611_v50  ;;  %vm618_vm6 = vweird.f32 %v1050_v51 }
0x12d4   :  { %vm619_vm8 = vmor %vm617_vm7, %vm618_vm6 }
0x12d5   :  { %v614_v53 = vsub.f32 1.0, %v613_v52 }
0x12d7   :  { %v615_v54 = vmul.f32 %v1050_v51, %v614_v53 }
0x12d9   :  { %v616_v55 = vadd.f32 %v1050_v51, %v615_v54 }
0x12db   :  { %v620_v58 = vsel %vm619_vm8, %v1050_v51, %v616_v55 }
0x12dc   :  { %v625_v61 = vsel %vm622_vm9, %v624_v59, %v620_v58  ;;  %vm901_vm9 = vcmask 1045504  }
0x12dd   :  { %v628_v63 = vmul.f32 %v625_v61, %v573_v30 }
0x1322   :  { %v631_v60 = vpop.permute.xlu2 %630 }
0x1323   :  { %v633_v62 = vmul.f32 %v631_v60, %v625_v61 }
0x1325   :  { %635 = vrot.lane.b32.xlu0 %v633_v62, %s1078_s14 }
0x1397   :  { %v636_v0 = vpop.permute.xlu0 %635 }
0x1398   :  { %v1288_v1 = vadd.f32 %v636_v0, %v628_v63 }
0x139a   :  { %1051 = vtanh.f32 %v1288_v1 }
0x13a0   :  { %v1052_v2 = vpop.eup %1051 }
0x13a1   :  { %641 = vrot.lane.b32.xlu1 %v1052_v2, %s1077_s13 }
0x1413   :  { %v642_v7 = vpop.permute.xlu1 %641 }
0x1414   :  { %v1320_v8 = vmul.f32 %v642_v7, %v625_v61 }
0x1416   :  { %670 = vrot.lane.b32.xlu0 %v1320_v8, %s1077_s13  ;;  %646 = vrot.lane.b32.xlu2 %v1320_v8, %s1078_s14 }
0x1470   :  { %v647_v9 = vpop.permute.xlu2 %646 }
0x1471   :  { %966 = vmatmul.msk.f32.vlgmr.msra.gmra.mxu1 %vm48_vm0, %v647_v9 }
0x1488   :  { %v671_v14 = vpop.permute.xlu0 %670 }
0x14ee   :  { %v667_v12 = vpop.f32.mrf.mxu1 }
0x14ef   :  { %v668_v13 = vadd.f32 %v1330_v11, %v667_v12  ;;  %v972_v12 = vld [vmem:[%s1372_s1 + $0x4] sm:$0x3] }
0x14f1   :  { %v673_v15 = vsel %vm48_vm0, %v668_v13, %v671_v14 }
0x14f2   :  { %967 = vmatmul.msk.f32.vlgmr.msra.gmra.mxu2 %vm50_vm1, %v673_v15 }
0x1575   :  { %v694_v16 = vpop.f32.mrf.mxu2 }
0x1576   :  { %v695_v17 = vadd.f32 %v1283_v44, %v694_v16 }
0x1578   :  { %1053 = vtanh.f32 %v695_v17  ;;  %v968_v19 = vmul.f32 -1.442695, %v695_v17 }
0x157a   :  { %1055 = vpow2.f32 %v968_v19 }
0x157e   :  { %v1054_v18 = vpop.eup %1053 }
0x157f   :  { %719 = vrot.lane.b32.xlu1 %v1054_v18, %s1077_s13 }
0x1580   :  { %v1056_v20 = vpop.eup %1055 }
0x1581   :  { %v700_v21 = vadd.f32 1.0, %v1056_v20 }
0x1583   :  { %1057 = vrcp.f32 %v700_v21  ;;  %v712_v26 = vand.u32 2147483648, %v700_v21  ;;  %vm706_vm11 = vweird.f32 %v700_v21  ;;  %v710_v27 = vand.u32 2147483647, %v700_v21 }
0x1585   :  { %v713_v29 = vor.u32 1.1754944e-38, %v712_v26  ;;  %vm711_vm13 = vcmp.eq.f32.partialorder %v710_v27, 8.507059e+37 }
0x1589   :  { %v1058_v22 = vpop.eup %1057 }
0x158a   :  { %v702_v23 = vmul.f32 %v1058_v22, %v700_v21  ;;  %vm707_vm10 = vweird.f32 %v1058_v22 }
0x158b   :  { %vm708_vm12 = vmor %vm706_vm11, %vm707_vm10 }
0x158c   :  { %v703_v10 = vsub.f32 1.0, %v702_v23 }
0x158e   :  { %v704_v24 = vmul.f32 %v1058_v22, %v703_v10 }
0x1590   :  { %v705_v25 = vadd.f32 %v1058_v22, %v704_v24 }
0x1592   :  { %v709_v28 = vsel %vm708_vm12, %v1058_v22, %v705_v25 }
0x1593   :  { %v714_v31 = vsel %vm711_vm13, %v713_v29, %v709_v28 }
0x1594   :  { %v717_v33 = vmul.f32 %v714_v31, %v1288_v1 }
0x15f1   :  { %v720_v30 = vpop.permute.xlu1 %719 }
0x15f2   :  { %v722_v32 = vmul.f32 %v720_v30, %v714_v31 }
0x15f4   :  { %724 = vrot.lane.b32.xlu2 %v722_v32, %s1078_s14 }
0x164e   :  { %v725_v34 = vpop.permute.xlu2 %724 }
0x164f   :  { %v727_v35 = vadd.f32 %v725_v34, %v717_v33 }
0x1651   :  { %1059 = vtanh.f32 %v727_v35 }
0x1657   :  { %v1060_v36 = vpop.eup %1059 }
0x1658   :  { %730 = vrot.lane.b32.xlu0 %v1060_v36, %s1077_s13 }
0x16ca   :  { %v731_v37 = vpop.permute.xlu0 %730 }
0x16cb   :  { %v733_v38 = vmul.f32 %v731_v37, %v714_v31 }
0x16cd   :  { %759 = vrot.lane.b32.xlu2 %v733_v38, %s1077_s13  ;;  %735 = vrot.lane.b32.xlu1 %v733_v38, %s1078_s14  ;;  %v890_v3 = vrot.slane %v733_v38, 6 }
0x16cf   :  { %v898_v7 = vsel %vm897_vm4, %v1320_v8, %v890_v3 }
0x1727   :  { %v760_v42 = vpop.permute.xlu2 %759 }
0x173f   :  { %v736_v39 = vpop.permute.xlu1 %735 }
0x1740   :  { %969 = vmatmul.msk.f32.vlgmr.msra.gmra.mxu3 %vm48_vm0, %v736_v39 }
0x17c3   :  { %v756_v40 = vpop.f32.mrf.mxu3 }
0x17c4   :  { %v757_v41 = vadd.f32 %v1330_v11, %v756_v40 }
0x17c6   :  { %v762_v43 = vsel %vm48_vm0, %v757_v41, %v760_v42 }
0x17c7   :  { %970 = vmatmul.msk.f32.vlgmr.msrb.gmra.mxu1 %vm50_vm1, %v762_v43 }
0x1844   :  { %v783_v45 = vpop.f32.mrf.mxu1 }
0x1845   :  { %v784_v46 = vadd.f32 %v1283_v44, %v783_v45 }
0x1847   :  { %1061 = vtanh.f32 %v784_v46  ;;  %v971_v48 = vmul.f32 -1.442695, %v784_v46 }
0x1849   :  { %1063 = vpow2.f32 %v971_v48 }
0x184d   :  { %v1062_v47 = vpop.eup %1061 }
0x184e   :  { %808 = vrot.lane.b32.xlu0 %v1062_v47, %s1077_s13 }
0x184f   :  { %v1064_v49 = vpop.eup %1063 }
0x1850   :  { %v789_v50 = vadd.f32 1.0, %v1064_v49 }
0x1852   :  { %1065 = vrcp.f32 %v789_v50  ;;  %v801_v56 = vand.u32 2147483648, %v789_v50  ;;  %vm795_vm15 = vweird.f32 %v789_v50  ;;  %v799_v57 = vand.u32 2147483647, %v789_v50 }
0x1854   :  { %v802_v59 = vor.u32 1.1754944e-38, %v801_v56  ;;  %vm800_vm3 = vcmp.eq.f32.partialorder %v799_v57, 8.507059e+37 }
0x1858   :  { %v1066_v51 = vpop.eup %1065 }
0x1859   :  { %v791_v52 = vmul.f32 %v1066_v51, %v789_v50  ;;  %vm796_vm14 = vweird.f32 %v1066_v51 }
0x185a   :  { %vm797_vm2 = vmor %vm795_vm15, %vm796_vm14 }
0x185b   :  { %v792_v53 = vsub.f32 1.0, %v791_v52 }
0x185d   :  { %v793_v54 = vmul.f32 %v1066_v51, %v792_v53 }
0x185f   :  { %v794_v55 = vadd.f32 %v1066_v51, %v793_v54 }
0x1861   :  { %v798_v58 = vsel %vm797_vm2, %v1066_v51, %v794_v55 }
0x1862   :  { %v803_v61 = vsel %vm800_vm3, %v802_v59, %v798_v58 }
0x1863   :  { %v806_v63 = vmul.f32 %v803_v61, %v727_v35 }
0x18c0   :  { %v809_v60 = vpop.permute.xlu0 %808 }
0x18c1   :  { %v811_v62 = vmul.f32 %v809_v60, %v803_v61 }
0x18c3   :  { %813 = vrot.lane.b32.xlu1 %v811_v62, %s1078_s14 }
0x1935   :  { %v814_v0 = vpop.permute.xlu1 %813 }
0x1936   :  { %v816_v1 = vadd.f32 %v814_v0, %v806_v63 }
0x1938   :  { %1067 = vtanh.f32 %v816_v1 }
0x193e   :  { %v1068_v2 = vpop.eup %1067 }
0x193f   :  { %819 = vrot.lane.b32.xlu2 %v1068_v2, %s1077_s13 }
0x1999   :  { %v820_v4 = vpop.permute.xlu2 %819 }
0x199a   :  { %v822_v5 = vmul.f32 %v820_v4, %v803_v61 }
0x199c   :  { %v892_v6 = vrot.slane %v822_v5, 4  ;;  %826 = vrot.lane.b32.xlu0 %v822_v5, %s1077_s13 }
0x199e   :  { %v900_v9 = vsel %vm899_vm5, %v898_v7, %v892_v6 }
0x1a0e   :  { %v827_v13 = vpop.permute.xlu0 %826 }
0x1a0f   :  { %v829_v14 = vsel %vm48_vm0, %v972_v12, %v827_v13 }
0x1a10   :  { %973 = vmatmul.msk.f32.vlgmr.msrb.gmra.mxu3 %vm50_vm1, %v829_v14 }
0x1a93   :  { %v850_v15 = vpop.f32.mrf.mxu3 }
0x1a94   :  { %v851_v16 = vadd.f32 %v1283_v44, %v850_v15 }
0x1a96   :  { %1069 = vtanh.f32 %v851_v16  ;;  %v974_v18 = vmul.f32 -1.442695, %v851_v16 }
0x1a98   :  { %1071 = vpow2.f32 %v974_v18 }
0x1a9c   :  { %v1070_v17 = vpop.eup %1069 }
0x1a9d   :  { %875 = vrot.lane.b32.xlu1 %v1070_v17, %s1077_s13 }
0x1a9e   :  { %v1072_v8 = vpop.eup %1071 }
0x1a9f   :  { %v856_v19 = vadd.f32 1.0, %v1072_v8 }
0x1aa1   :  { %1073 = vrcp.f32 %v856_v19  ;;  %v868_v24 = vand.u32 2147483648, %v856_v19  ;;  %vm862_vm1 = vweird.f32 %v856_v19  ;;  %v866_v25 = vand.u32 2147483647, %v856_v19 }
0x1aa3   :  { %v869_v26 = vor.u32 1.1754944e-38, %v868_v24  ;;  %vm867_vm8 = vcmp.eq.f32.partialorder %v866_v25, 8.507059e+37 }
0x1aa7   :  { %v1074_v20 = vpop.eup %1073 }
0x1aa8   :  { %v858_v21 = vmul.f32 %v1074_v20, %v856_v19  ;;  %vm863_vm6 = vweird.f32 %v1074_v20 }
0x1aa9   :  { %vm864_vm7 = vmor %vm862_vm1, %vm863_vm6 }
0x1aaa   :  { %v859_v22 = vsub.f32 1.0, %v858_v21 }
0x1aac   :  { %v860_v23 = vmul.f32 %v1074_v20, %v859_v22 }
0x1aae   :  { %v861_v10 = vadd.f32 %v1074_v20, %v860_v23 }
0x1ab0   :  { %v865_v44 = vsel %vm864_vm7, %v1074_v20, %v861_v10 }
0x1ab1   :  { %v870_v28 = vsel %vm867_vm8, %v869_v26, %v865_v44 }
0x1ab2   :  { %v873_v30 = vmul.f32 %v870_v28, %v816_v1 }
0x1b0f   :  { %v876_v27 = vpop.permute.xlu1 %875 }
0x1b10   :  { %v878_v29 = vmul.f32 %v876_v27, %v870_v28 }
0x1b12   :  { %880 = vrot.lane.b32.xlu2 %v878_v29, %s1078_s14 }
0x1b6c   :  { %v881_v31 = vpop.permute.xlu2 %880 }
0x1b6d   :  { %v883_v32 = vadd.f32 %v881_v31, %v873_v30 }
0x1b6f   :  { %1075 = vtanh.f32 %v883_v32 }
0x1b75   :  { %v1076_v33 = vpop.eup %1075 }
0x1b76   :  { %886 = vrot.lane.b32.xlu0 %v1076_v33, %s1077_s13 }
0x1be8   :  { %v887_v34 = vpop.permute.xlu0 %886 }
0x1be9   :  { %v889_v35 = vmul.f32 %v887_v34, %v870_v28 }
0x1beb   :  { %v895_v36 = vrot.slane %v889_v35, 2 }
0x1bed   :  { %v902_v37 = vsel %vm901_vm9, %v900_v9, %v895_v36 }
0x1bee   :  { %904 = vrot.lane.b32.xlu1 %v902_v37, %s1078_s14 }
0x1c60   :  { %v905_v38 = vpop.permute.xlu1 %904 }
0x1c61   :  { %975 = vmatmul.msk.f32.vlgmr.msrb.gmra.mxu0 %vm48_vm0, %v905_v38 }
0x1cde   :  { %v925_v39 = vpop.f32.mrf.mxu0 }
0x1cdf   :  { %v926_v40 = vadd.f32 %v1330_v11, %v925_v39 }
0x1ce1   :  { %928 = vst.msk [vmem:[%s1373_s5] sm:$0xff] %vm48_vm0, %v926_v40 }

</bundles_post_ra>
